<compile_context>
chip_gen: v6e
topology: v6e:2x2x1
jax: 0.10.0
libtpu: 0.0.40
codegen_flags: <defaults>
</compile_context>

<pallas_src>
import jax
import jax.numpy as jnp
from jax.experimental import pallas as pl
from jax.experimental.pallas import tpu as pltpu


def _round_up(x, m):
    return (x + m - 1) // m * m


def _sigmoid(x):
    # sigmoid(x) == 0.5 * tanh(0.5 * x) + 0.5 (exact): one EUP tanh instead of
    # exp + divide.
    return 0.5 * jnp.tanh(0.5 * x) + 0.5


def _lstm_chunk_kernel(zx_ref, wh_hbm, out_ref, wh_vmem, copy_sem, c_ref, h_ref):
    """Grid = (batch_tiles, seq_chunks).  The seq axis is sequential
    ("arbitrary"); c/h live in VMEM scratch and carry across seq chunks,
    re-initialized at the start of every batch tile.  zx/out blocks are
    time-major: (t_chunk, bt, 4*hp) / (t_chunk, bt, hp)."""
    seq_chunk = pl.program_id(1)

    @pl.when(seq_chunk == 0)
    def _():
        # Start the (single-buffered) Wh HBM->VMEM DMA, overlap it with the
        # state zero-init, and wait only right before the first dot needs it.
        copy = pltpu.make_async_copy(wh_hbm, wh_vmem, copy_sem)
        copy.start()
        c_ref[...] = jnp.zeros_like(c_ref)
        h_ref[...] = jnp.zeros_like(h_ref)
        copy.wait()

    hp = c_ref.shape[-1]          # padded hidden (multiple of 128)
    t_chunk = out_ref.shape[0]    # timesteps per grid step
    wh_dtype = wh_vmem.dtype

    c = c_ref[...]
    h = h_ref[...]

    # Statically unrolled inner time loop.  Only the (B, H) x (H, 4H) recurrent
    # matmul + gate math sits on the serial critical path; x @ Wx + b was
    # precomputed and arrives as zx (pipelined by the BlockSpec).  zx_ref[t] /
    # out_ref[t] index the leading (time) axis -> full-tile, unmasked accesses.
    for t in range(t_chunk):
        z = zx_ref[t].astype(jnp.float32) + jnp.dot(
            h.astype(wh_dtype), wh_vmem[...], preferred_element_type=jnp.float32)
        f = _sigmoid(z[:, 0 * hp:1 * hp])
        i = _sigmoid(z[:, 1 * hp:2 * hp])
        g = jnp.tanh(z[:, 2 * hp:3 * hp])
        o = _sigmoid(z[:, 3 * hp:4 * hp])
        c = f * c + i * g
        h = o * jnp.tanh(c)
        out_ref[t] = h.astype(out_ref.dtype)

    c_ref[...] = c
    h_ref[...] = h


def lstm_layer(x, wx, wh, b, *, t_chunk=16, weight_dtype=jnp.bfloat16):
    """x: (batch, seq, input_dim) f32
       wx: (input_dim, 4*hidden), wh: (hidden, 4*hidden), b: (1, 4*hidden)
       Stacked gate order is [forget, input, candidate, output].
       Returns hidden_states: (batch, seq, hidden), matching the PyTorch module."""
    batch, seq, input_dim = x.shape
    hidden = wh.shape[0]
    assert wx.shape == (input_dim, 4 * hidden)
    assert wh.shape == (hidden, 4 * hidden)
    assert b.shape == (1, 4 * hidden)

    if weight_dtype is None:
        weight_dtype = wh.dtype

    hp = _round_up(hidden, 128)                 # lane-dense hidden / gate width
    bp = _round_up(batch, 8)                    # f32 sublane multiple
    t_chunk = max(1, min(t_chunk, _round_up(seq, 8)))
    sp = _round_up(seq, t_chunk)                # whole chunks

    # Pad weights per gate so gate k occupies the lane-aligned slab
    # [k*hp, (k+1)*hp).  Padded h/c columns stay exactly 0 (their gate
    # pre-activations are 0), so they never pollute the real outputs.
    wx4 = wx.reshape(input_dim, 4, hidden)
    wh4 = wh.reshape(hidden, 4, hidden)
    b4 = b.reshape(4, hidden)
    wx_p = jnp.zeros((input_dim, 4, hp), wx.dtype).at[:, :, :hidden].set(wx4)
    wx_p = wx_p.reshape(input_dim, 4 * hp)
    wh_p = jnp.zeros((hp, 4, hp), weight_dtype).at[:hidden, :, :hidden].set(
        wh4.astype(weight_dtype))
    wh_p = wh_p.reshape(hp, 4 * hp)
    b_p = jnp.zeros((4, hp), jnp.float32).at[:, :hidden].set(
        b4.astype(jnp.float32)).reshape(4 * hp)

    x_p = jnp.zeros((bp, sp, input_dim), x.dtype).at[:batch, :seq, :].set(x)

    # Hoisted input projection: one big parallel matmul outside the recurrence,
    # bias folded in, produced TIME-MAJOR so the kernel's per-step slices are
    # leading-axis (full-tile) accesses.
    zx = jnp.einsum("bsd,dg->sbg", x_p, wx_p,
                    preferred_element_type=jnp.float32) + b_p   # (sp, bp, 4*hp)

    # >= 2 batch tiles when possible so the "parallel" axis can use both
    # TensorCores on v7x; each tile keeps its own resident Wh copy.
    bt = bp // 2 if (bp >= 16 and bp % 16 == 0) else bp
    grid = (bp // bt, sp // t_chunk)

    # VMEM budget: resident Wh + double-buffered zx/out blocks + c/h carries,
    # with margin, capped at 48 MiB for v7x headroom.
    wdt_bytes = jnp.dtype(weight_dtype).itemsize
    needed = (hp * 4 * hp * wdt_bytes                  # Wh scratch
              + 2 * t_chunk * bt * 4 * hp * 4          # zx double-buffer (f32)
              + 2 * t_chunk * bt * hp * jnp.dtype(x.dtype).itemsize
              + 2 * bt * hp * 4)                       # c/h carries
    vmem_limit = int(min(48 * 1024 * 1024, max(16 * 1024 * 1024, 2 * needed)))

    out_p = pl.pallas_call(
        _lstm_chunk_kernel,
        out_shape=jax.ShapeDtypeStruct((sp, bp, hp), x.dtype),
        grid_spec=pltpu.PrefetchScalarGridSpec(
            num_scalar_prefetch=0,
            grid=grid,
            in_specs=[
                # Time-major z_x chunk: pipelined/double-buffered by Pallas.
                pl.BlockSpec((t_chunk, bt, 4 * hp), lambda i, c: (c, i, 0)),
                # Wh stays in HBM; DMA'd once per batch tile into VMEM scratch.
                pl.BlockSpec(memory_space=pl.ANY),
            ],
            out_specs=pl.BlockSpec((t_chunk, bt, hp), lambda i, c: (c, i, 0)),
            scratch_shapes=[
                pltpu.VMEM((hp, 4 * hp), weight_dtype),  # resident Wh
                pltpu.SemaphoreType.DMA,                 # Wh copy semaphore
                pltpu.VMEM((bt, hp), jnp.float32),       # c_t carry
                pltpu.VMEM((bt, hp), jnp.float32),       # h_t carry
            ],
        ),
        compiler_params=pltpu.CompilerParams(
            # batch tiles independent (v7x dual-TC); seq chunks carry state.
            dimension_semantics=("parallel", "arbitrary"),
            vmem_limit_bytes=vmem_limit,
        ),
    )(zx, wh_p)

    # One cheap, fully parallel transpose back to batch-major, then slice pads.
    return jnp.transpose(out_p, (1, 0, 2))[:batch, :seq, :hidden]


def lstm_ref(x, wx, wh, b):
    """Pure-JAX reference mirroring the PyTorch loop (gate order f, i, g, o)."""
    batch, seq, _ = x.shape
    hidden = wh.shape[0]
    c = jnp.zeros((batch, hidden), jnp.float32)
    h = jnp.zeros((batch, hidden), jnp.float32)
    outs = []
    for t in range(seq):
        z = x[:, t, :] @ wx + h @ wh + b
        f = jax.nn.sigmoid(z[:, 0 * hidden:1 * hidden])
        i = jax.nn.sigmoid(z[:, 1 * hidden:2 * hidden])
        g = jnp.tanh(z[:, 2 * hidden:3 * hidden])
        o = jax.nn.sigmoid(z[:, 3 * hidden:4 * hidden])
        c = f * c + i * g
        h = o * jnp.tanh(c)
        outs.append(h[:, None, :])
    return jnp.concatenate(outs, axis=1)


if __name__ == "__main__":
    batch, seq, input_dim, hidden = 2, 8, 16, 32

    key = jax.random.PRNGKey(0)
    k_x, k_wx, k_wh, k_b = jax.random.split(key, 4)

    x = jax.random.normal(k_x, (batch, seq, input_dim), jnp.float32)
    # Stacked gate weights, gate order [forget, input, candidate, output].
    wx = jax.random.normal(k_wx, (input_dim, 4 * hidden), jnp.float32) * 0.1
    wh = jax.random.normal(k_wh, (hidden, 4 * hidden), jnp.float32) * 0.1
    b = jax.random.normal(k_b, (1, 4 * hidden), jnp.float32) * 0.1

    ref = lstm_ref(x, wx, wh, b)

    # f32-weight path: tight tolerance (validates kernel math exactly).
    out_f32 = jax.block_until_ready(
        jax.jit(lambda *a: lstm_layer(*a, weight_dtype=jnp.float32))(x, wx, wh, b))
    assert out_f32.shape == (batch, seq, hidden)
    assert jnp.allclose(out_f32, ref, atol=1e-4, rtol=1e-4), "f32 mismatch vs reference"

    # Default (bf16 recurrent weights) path: looser tolerance.
    out_bf16 = jax.block_until_ready(jax.jit(lstm_layer)(x, wx, wh, b))
    assert out_bf16.shape == (batch, seq, hidden)
    assert jnp.allclose(out_bf16, ref, atol=3e-2, rtol=3e-2), "bf16 mismatch vs reference"

    print("KERNEL_OK")
</pallas_src>

<mosaic_0001>
module attributes {stable_mosaic.version = 11 : i64} {
  func.func @_lstm_chunk_kernel(%arg0: i32, %arg1: i32, %arg2: memref<8x8x512xf32, #tpu.memory_space<vmem>>, %arg3: memref<128x512xf32, #tpu.memory_space<any>>, %arg4: memref<8x8x128xf32, #tpu.memory_space<vmem>>, %arg5: memref<128x512xf32, #tpu.memory_space<vmem>>, %arg6: memref<!tpu.dma_semaphore, #tpu.memory_space<semaphore_mem>>, %arg7: memref<8x128xf32, #tpu.memory_space<vmem>>, %arg8: memref<8x128xf32, #tpu.memory_space<vmem>>) attributes {dimension_semantics = [#tpu.dimension_semantics<parallel>, #tpu.dimension_semantics<arbitrary>], iteration_bounds = array<i64: 1, 1>, scalar_prefetch = 0 : i64, scratch_operands = 4 : i64, tpu.core_type = #tpu.core_type<tc>, window_params = [{transform_indices = @transform_0, window_bounds = array<i64: 8, 8, 512>}, {}, {transform_indices = @transform_2, window_bounds = array<i64: 8, 8, 128>}]} {
    %c0_i32 = arith.constant 0 : i32
    %0 = arith.cmpi eq, %arg1, %c0_i32 : i32
    %1 = arith.extui %0 : i1 to i32
    %c0_i32_0 = arith.constant 0 : i32
    %2 = arith.cmpi ne, %1, %c0_i32_0 : i32
    scf.if %2 {
      tpu.enqueue_dma source(%arg3 : memref<128x512xf32, #tpu.memory_space<any>>) target(%arg5 : memref<128x512xf32, #tpu.memory_space<vmem>>) target_semaphore(%arg6 : memref<!tpu.dma_semaphore, #tpu.memory_space<semaphore_mem>>)
      %cst_144 = arith.constant 0.000000e+00 : f32
      %319 = vector.broadcast %cst_144 : f32 to vector<8x128xf32>
      %c0_145 = arith.constant 0 : index
      %c0_146 = arith.constant 0 : index
      %320 = vector.load %arg7[%c0_145, %c0_146] : memref<8x128xf32, #tpu.memory_space<vmem>>, vector<8x128xf32>
      tpu.vector_store %arg7[%c0_145, %c0_146], %319 {strides = array<i32>} : memref<8x128xf32, #tpu.memory_space<vmem>>, vector<8x128xf32>,
      %cst_147 = arith.constant 0.000000e+00 : f32
      %321 = vector.broadcast %cst_147 : f32 to vector<8x128xf32>
      %c0_148 = arith.constant 0 : index
      %c0_149 = arith.constant 0 : index
      %322 = vector.load %arg8[%c0_148, %c0_149] : memref<8x128xf32, #tpu.memory_space<vmem>>, vector<8x128xf32>
      tpu.vector_store %arg8[%c0_148, %c0_149], %321 {strides = array<i32>} : memref<8x128xf32, #tpu.memory_space<vmem>>, vector<8x128xf32>,
      tpu.wait_dma2 semaphore(%arg6 : memref<!tpu.dma_semaphore, #tpu.memory_space<semaphore_mem>>) src(%arg3 : memref<128x512xf32, #tpu.memory_space<any>>) dst(%arg5 : memref<128x512xf32, #tpu.memory_space<vmem>>)
    } else {
    }
    %c0 = arith.constant 0 : index
    %c0_1 = arith.constant 0 : index
    %3 = vector.load %arg7[%c0, %c0_1] : memref<8x128xf32, #tpu.memory_space<vmem>>, vector<8x128xf32>
    %c0_2 = arith.constant 0 : index
    %c0_3 = arith.constant 0 : index
    %4 = vector.load %arg8[%c0_2, %c0_3] : memref<8x128xf32, #tpu.memory_space<vmem>>, vector<8x128xf32>
    %c0_4 = arith.constant 0 : index
    %c0_5 = arith.constant 0 : index
    %c0_6 = arith.constant 0 : index
    %5 = vector.load %arg2[%c0_4, %c0_5, %c0_6] : memref<8x8x512xf32, #tpu.memory_space<vmem>>, vector<1x8x512xf32>
    %6 = vector.shape_cast %5 : vector<1x8x512xf32> to vector<8x512xf32>
    %c0_7 = arith.constant 0 : index
    %c0_8 = arith.constant 0 : index
    %7 = vector.load %arg5[%c0_7, %c0_8] : memref<128x512xf32, #tpu.memory_space<vmem>>, vector<128x512xf32>
    %cst = arith.constant dense<0.000000e+00> : vector<8x512xf32>
    %8 = tpu.matmul %4, %7, %cst {dimension_numbers = #tpu.dot_dimension_numbers<[1], [0], [0], [1], [0, 0, 1, 1], [], []>} : vector<8x128xf32>, vector<128x512xf32>, vector<8x512xf32> -> vector<8x512xf32>
    %9 = arith.addf %6, %8 : vector<8x512xf32>
    %10 = vector.extract_strided_slice %9 {offsets = [0, 0], sizes = [8, 128], strides = [1, 1]} : vector<8x512xf32> to vector<8x128xf32>
    %cst_9 = arith.constant 5.000000e-01 : f32
    %11 = vector.broadcast %cst_9 : f32 to vector<8x128xf32>
    %12 = arith.mulf %11, %10 : vector<8x128xf32>
    %13 = math.tanh %12 : vector<8x128xf32>
    %cst_10 = arith.constant 5.000000e-01 : f32
    %14 = vector.broadcast %cst_10 : f32 to vector<8x128xf32>
    %15 = arith.mulf %14, %13 : vector<8x128xf32>
    %cst_11 = arith.constant 5.000000e-01 : f32
    %16 = vector.broadcast %cst_11 : f32 to vector<8x128xf32>
    %17 = arith.addf %15, %16 : vector<8x128xf32>
    %18 = vector.extract_strided_slice %9 {offsets = [0, 128], sizes = [8, 128], strides = [1, 1]} : vector<8x512xf32> to vector<8x128xf32>
    %cst_12 = arith.constant 5.000000e-01 : f32
    %19 = vector.broadcast %cst_12 : f32 to vector<8x128xf32>
    %20 = arith.mulf %19, %18 : vector<8x128xf32>
    %21 = math.tanh %20 : vector<8x128xf32>
    %cst_13 = arith.constant 5.000000e-01 : f32
    %22 = vector.broadcast %cst_13 : f32 to vector<8x128xf32>
    %23 = arith.mulf %22, %21 : vector<8x128xf32>
    %cst_14 = arith.constant 5.000000e-01 : f32
    %24 = vector.broadcast %cst_14 : f32 to vector<8x128xf32>
    %25 = arith.addf %23, %24 : vector<8x128xf32>
    %26 = vector.extract_strided_slice %9 {offsets = [0, 256], sizes = [8, 128], strides = [1, 1]} : vector<8x512xf32> to vector<8x128xf32>
    %27 = math.tanh %26 : vector<8x128xf32>
    %28 = vector.extract_strided_slice %9 {offsets = [0, 384], sizes = [8, 128], strides = [1, 1]} : vector<8x512xf32> to vector<8x128xf32>
    %cst_15 = arith.constant 5.000000e-01 : f32
    %29 = vector.broadcast %cst_15 : f32 to vector<8x128xf32>
    %30 = arith.mulf %29, %28 : vector<8x128xf32>
    %31 = math.tanh %30 : vector<8x128xf32>
    %cst_16 = arith.constant 5.000000e-01 : f32
    %32 = vector.broadcast %cst_16 : f32 to vector<8x128xf32>
    %33 = arith.mulf %32, %31 : vector<8x128xf32>
    %cst_17 = arith.constant 5.000000e-01 : f32
    %34 = vector.broadcast %cst_17 : f32 to vector<8x128xf32>
    %35 = arith.addf %33, %34 : vector<8x128xf32>
    %36 = arith.mulf %17, %3 : vector<8x128xf32>
    %37 = arith.mulf %25, %27 : vector<8x128xf32>
    %38 = arith.addf %36, %37 : vector<8x128xf32>
    %39 = math.tanh %38 : vector<8x128xf32>
    %40 = arith.mulf %35, %39 : vector<8x128xf32>
    %c0_18 = arith.constant 0 : index
    %c0_19 = arith.constant 0 : index
    %c0_20 = arith.constant 0 : index
    %41 = vector.load %arg4[%c0_18, %c0_19, %c0_20] : memref<8x8x128xf32, #tpu.memory_space<vmem>>, vector<1x8x128xf32>
    %42 = vector.shape_cast %41 : vector<1x8x128xf32> to vector<8x128xf32>
    %43 = vector.shape_cast %40 : vector<8x128xf32> to vector<1x8x128xf32>
    tpu.vector_store %arg4[%c0_18, %c0_19, %c0_20], %43 {strides = array<i32>} : memref<8x8x128xf32, #tpu.memory_space<vmem>>, vector<1x8x128xf32>,
    %c1 = arith.constant 1 : index
    %c0_21 = arith.constant 0 : index
    %c0_22 = arith.constant 0 : index
    %44 = vector.load %arg2[%c1, %c0_21, %c0_22] : memref<8x8x512xf32, #tpu.memory_space<vmem>>, vector<1x8x512xf32>
    %45 = vector.shape_cast %44 : vector<1x8x512xf32> to vector<8x512xf32>
    %c0_23 = arith.constant 0 : index
    %c0_24 = arith.constant 0 : index
    %46 = vector.load %arg5[%c0_23, %c0_24] : memref<128x512xf32, #tpu.memory_space<vmem>>, vector<128x512xf32>
    %cst_25 = arith.constant dense<0.000000e+00> : vector<8x512xf32>
    %47 = tpu.matmul %40, %46, %cst_25 {dimension_numbers = #tpu.dot_dimension_numbers<[1], [0], [0], [1], [0, 0, 1, 1], [], []>} : vector<8x128xf32>, vector<128x512xf32>, vector<8x512xf32> -> vector<8x512xf32>
    %48 = arith.addf %45, %47 : vector<8x512xf32>
    %49 = vector.extract_strided_slice %48 {offsets = [0, 0], sizes = [8, 128], strides = [1, 1]} : vector<8x512xf32> to vector<8x128xf32>
    %cst_26 = arith.constant 5.000000e-01 : f32
    %50 = vector.broadcast %cst_26 : f32 to vector<8x128xf32>
    %51 = arith.mulf %50, %49 : vector<8x128xf32>
    %52 = math.tanh %51 : vector<8x128xf32>
    %cst_27 = arith.constant 5.000000e-01 : f32
    %53 = vector.broadcast %cst_27 : f32 to vector<8x128xf32>
    %54 = arith.mulf %53, %52 : vector<8x128xf32>
    %cst_28 = arith.constant 5.000000e-01 : f32
    %55 = vector.broadcast %cst_28 : f32 to vector<8x128xf32>
    %56 = arith.addf %54, %55 : vector<8x128xf32>
    %57 = vector.extract_strided_slice %48 {offsets = [0, 128], sizes = [8, 128], strides = [1, 1]} : vector<8x512xf32> to vector<8x128xf32>
    %cst_29 = arith.constant 5.000000e-01 : f32
    %58 = vector.broadcast %cst_29 : f32 to vector<8x128xf32>
    %59 = arith.mulf %58, %57 : vector<8x128xf32>
    %60 = math.tanh %59 : vector<8x128xf32>
    %cst_30 = arith.constant 5.000000e-01 : f32
    %61 = vector.broadcast %cst_30 : f32 to vector<8x128xf32>
    %62 = arith.mulf %61, %60 : vector<8x128xf32>
    %cst_31 = arith.constant 5.000000e-01 : f32
    %63 = vector.broadcast %cst_31 : f32 to vector<8x128xf32>
    %64 = arith.addf %62, %63 : vector<8x128xf32>
    %65 = vector.extract_strided_slice %48 {offsets = [0, 256], sizes = [8, 128], strides = [1, 1]} : vector<8x512xf32> to vector<8x128xf32>
    %66 = math.tanh %65 : vector<8x128xf32>
    %67 = vector.extract_strided_slice %48 {offsets = [0, 384], sizes = [8, 128], strides = [1, 1]} : vector<8x512xf32> to vector<8x128xf32>
    %cst_32 = arith.constant 5.000000e-01 : f32
    %68 = vector.broadcast %cst_32 : f32 to vector<8x128xf32>
    %69 = arith.mulf %68, %67 : vector<8x128xf32>
    %70 = math.tanh %69 : vector<8x128xf32>
    %cst_33 = arith.constant 5.000000e-01 : f32
    %71 = vector.broadcast %cst_33 : f32 to vector<8x128xf32>
    %72 = arith.mulf %71, %70 : vector<8x128xf32>
    %cst_34 = arith.constant 5.000000e-01 : f32
    %73 = vector.broadcast %cst_34 : f32 to vector<8x128xf32>
    %74 = arith.addf %72, %73 : vector<8x128xf32>
    %75 = arith.mulf %56, %38 : vector<8x128xf32>
    %76 = arith.mulf %64, %66 : vector<8x128xf32>
    %77 = arith.addf %75, %76 : vector<8x128xf32>
    %78 = math.tanh %77 : vector<8x128xf32>
    %79 = arith.mulf %74, %78 : vector<8x128xf32>
    %c1_35 = arith.constant 1 : index
    %c0_36 = arith.constant 0 : index
    %c0_37 = arith.constant 0 : index
    %80 = vector.load %arg4[%c1_35, %c0_36, %c0_37] : memref<8x8x128xf32, #tpu.memory_space<vmem>>, vector<1x8x128xf32>
    %81 = vector.shape_cast %80 : vector<1x8x128xf32> to vector<8x128xf32>
    %82 = vector.shape_cast %79 : vector<8x128xf32> to vector<1x8x128xf32>
    tpu.vector_store %arg4[%c1_35, %c0_36, %c0_37], %82 {strides = array<i32>} : memref<8x8x128xf32, #tpu.memory_space<vmem>>, vector<1x8x128xf32>,
    %c2 = arith.constant 2 : index
    %c0_38 = arith.constant 0 : index
    %c0_39 = arith.constant 0 : index
    %83 = vector.load %arg2[%c2, %c0_38, %c0_39] : memref<8x8x512xf32, #tpu.memory_space<vmem>>, vector<1x8x512xf32>
    %84 = vector.shape_cast %83 : vector<1x8x512xf32> to vector<8x512xf32>
    %c0_40 = arith.constant 0 : index
    %c0_41 = arith.constant 0 : index
    %85 = vector.load %arg5[%c0_40, %c0_41] : memref<128x512xf32, #tpu.memory_space<vmem>>, vector<128x512xf32>
    %cst_42 = arith.constant dense<0.000000e+00> : vector<8x512xf32>
    %86 = tpu.matmul %79, %85, %cst_42 {dimension_numbers = #tpu.dot_dimension_numbers<[1], [0], [0], [1], [0, 0, 1, 1], [], []>} : vector<8x128xf32>, vector<128x512xf32>, vector<8x512xf32> -> vector<8x512xf32>
    %87 = arith.addf %84, %86 : vector<8x512xf32>
    %88 = vector.extract_strided_slice %87 {offsets = [0, 0], sizes = [8, 128], strides = [1, 1]} : vector<8x512xf32> to vector<8x128xf32>
    %cst_43 = arith.constant 5.000000e-01 : f32
    %89 = vector.broadcast %cst_43 : f32 to vector<8x128xf32>
    %90 = arith.mulf %89, %88 : vector<8x128xf32>
    %91 = math.tanh %90 : vector<8x128xf32>
    %cst_44 = arith.constant 5.000000e-01 : f32
    %92 = vector.broadcast %cst_44 : f32 to vector<8x128xf32>
    %93 = arith.mulf %92, %91 : vector<8x128xf32>
    %cst_45 = arith.constant 5.000000e-01 : f32
    %94 = vector.broadcast %cst_45 : f32 to vector<8x128xf32>
    %95 = arith.addf %93, %94 : vector<8x128xf32>
    %96 = vector.extract_strided_slice %87 {offsets = [0, 128], sizes = [8, 128], strides = [1, 1]} : vector<8x512xf32> to vector<8x128xf32>
    %cst_46 = arith.constant 5.000000e-01 : f32
    %97 = vector.broadcast %cst_46 : f32 to vector<8x128xf32>
    %98 = arith.mulf %97, %96 : vector<8x128xf32>
    %99 = math.tanh %98 : vector<8x128xf32>
    %cst_47 = arith.constant 5.000000e-01 : f32
    %100 = vector.broadcast %cst_47 : f32 to vector<8x128xf32>
    %101 = arith.mulf %100, %99 : vector<8x128xf32>
    %cst_48 = arith.constant 5.000000e-01 : f32
    %102 = vector.broadcast %cst_48 : f32 to vector<8x128xf32>
    %103 = arith.addf %101, %102 : vector<8x128xf32>
    %104 = vector.extract_strided_slice %87 {offsets = [0, 256], sizes = [8, 128], strides = [1, 1]} : vector<8x512xf32> to vector<8x128xf32>
    %105 = math.tanh %104 : vector<8x128xf32>
    %106 = vector.extract_strided_slice %87 {offsets = [0, 384], sizes = [8, 128], strides = [1, 1]} : vector<8x512xf32> to vector<8x128xf32>
    %cst_49 = arith.constant 5.000000e-01 : f32
    %107 = vector.broadcast %cst_49 : f32 to vector<8x128xf32>
    %108 = arith.mulf %107, %106 : vector<8x128xf32>
    %109 = math.tanh %108 : vector<8x128xf32>
    %cst_50 = arith.constant 5.000000e-01 : f32
    %110 = vector.broadcast %cst_50 : f32 to vector<8x128xf32>
    %111 = arith.mulf %110, %109 : vector<8x128xf32>
    %cst_51 = arith.constant 5.000000e-01 : f32
    %112 = vector.broadcast %cst_51 : f32 to vector<8x128xf32>
    %113 = arith.addf %111, %112 : vector<8x128xf32>
    %114 = arith.mulf %95, %77 : vector<8x128xf32>
    %115 = arith.mulf %103, %105 : vector<8x128xf32>
    %116 = arith.addf %114, %115 : vector<8x128xf32>
    %117 = math.tanh %116 : vector<8x128xf32>
    %118 = arith.mulf %113, %117 : vector<8x128xf32>
    %c2_52 = arith.constant 2 : index
    %c0_53 = arith.constant 0 : index
    %c0_54 = arith.constant 0 : index
    %119 = vector.load %arg4[%c2_52, %c0_53, %c0_54] : memref<8x8x128xf32, #tpu.memory_space<vmem>>, vector<1x8x128xf32>
    %120 = vector.shape_cast %119 : vector<1x8x128xf32> to vector<8x128xf32>
    %121 = vector.shape_cast %118 : vector<8x128xf32> to vector<1x8x128xf32>
    tpu.vector_store %arg4[%c2_52, %c0_53, %c0_54], %121 {strides = array<i32>} : memref<8x8x128xf32, #tpu.memory_space<vmem>>, vector<1x8x128xf32>,
    %c3 = arith.constant 3 : index
    %c0_55 = arith.constant 0 : index
    %c0_56 = arith.constant 0 : index
    %122 = vector.load %arg2[%c3, %c0_55, %c0_56] : memref<8x8x512xf32, #tpu.memory_space<vmem>>, vector<1x8x512xf32>
    %123 = vector.shape_cast %122 : vector<1x8x512xf32> to vector<8x512xf32>
    %c0_57 = arith.constant 0 : index
    %c0_58 = arith.constant 0 : index
    %124 = vector.load %arg5[%c0_57, %c0_58] : memref<128x512xf32, #tpu.memory_space<vmem>>, vector<128x512xf32>
    %cst_59 = arith.constant dense<0.000000e+00> : vector<8x512xf32>
    %125 = tpu.matmul %118, %124, %cst_59 {dimension_numbers = #tpu.dot_dimension_numbers<[1], [0], [0], [1], [0, 0, 1, 1], [], []>} : vector<8x128xf32>, vector<128x512xf32>, vector<8x512xf32> -> vector<8x512xf32>
    %126 = arith.addf %123, %125 : vector<8x512xf32>
    %127 = vector.extract_strided_slice %126 {offsets = [0, 0], sizes = [8, 128], strides = [1, 1]} : vector<8x512xf32> to vector<8x128xf32>
    %cst_60 = arith.constant 5.000000e-01 : f32
    %128 = vector.broadcast %cst_60 : f32 to vector<8x128xf32>
    %129 = arith.mulf %128, %127 : vector<8x128xf32>
    %130 = math.tanh %129 : vector<8x128xf32>
    %cst_61 = arith.constant 5.000000e-01 : f32
    %131 = vector.broadcast %cst_61 : f32 to vector<8x128xf32>
    %132 = arith.mulf %131, %130 : vector<8x128xf32>
    %cst_62 = arith.constant 5.000000e-01 : f32
    %133 = vector.broadcast %cst_62 : f32 to vector<8x128xf32>
    %134 = arith.addf %132, %133 : vector<8x128xf32>
    %135 = vector.extract_strided_slice %126 {offsets = [0, 128], sizes = [8, 128], strides = [1, 1]} : vector<8x512xf32> to vector<8x128xf32>
    %cst_63 = arith.constant 5.000000e-01 : f32
    %136 = vector.broadcast %cst_63 : f32 to vector<8x128xf32>
    %137 = arith.mulf %136, %135 : vector<8x128xf32>
    %138 = math.tanh %137 : vector<8x128xf32>
    %cst_64 = arith.constant 5.000000e-01 : f32
    %139 = vector.broadcast %cst_64 : f32 to vector<8x128xf32>
    %140 = arith.mulf %139, %138 : vector<8x128xf32>
    %cst_65 = arith.constant 5.000000e-01 : f32
    %141 = vector.broadcast %cst_65 : f32 to vector<8x128xf32>
    %142 = arith.addf %140, %141 : vector<8x128xf32>
    %143 = vector.extract_strided_slice %126 {offsets = [0, 256], sizes = [8, 128], strides = [1, 1]} : vector<8x512xf32> to vector<8x128xf32>
    %144 = math.tanh %143 : vector<8x128xf32>
    %145 = vector.extract_strided_slice %126 {offsets = [0, 384], sizes = [8, 128], strides = [1, 1]} : vector<8x512xf32> to vector<8x128xf32>
    %cst_66 = arith.constant 5.000000e-01 : f32
    %146 = vector.broadcast %cst_66 : f32 to vector<8x128xf32>
    %147 = arith.mulf %146, %145 : vector<8x128xf32>
    %148 = math.tanh %147 : vector<8x128xf32>
    %cst_67 = arith.constant 5.000000e-01 : f32
    %149 = vector.broadcast %cst_67 : f32 to vector<8x128xf32>
    %150 = arith.mulf %149, %148 : vector<8x128xf32>
    %cst_68 = arith.constant 5.000000e-01 : f32
    %151 = vector.broadcast %cst_68 : f32 to vector<8x128xf32>
    %152 = arith.addf %150, %151 : vector<8x128xf32>
    %153 = arith.mulf %134, %116 : vector<8x128xf32>
    %154 = arith.mulf %142, %144 : vector<8x128xf32>
    %155 = arith.addf %153, %154 : vector<8x128xf32>
    %156 = math.tanh %155 : vector<8x128xf32>
    %157 = arith.mulf %152, %156 : vector<8x128xf32>
    %c3_69 = arith.constant 3 : index
    %c0_70 = arith.constant 0 : index
    %c0_71 = arith.constant 0 : index
    %158 = vector.load %arg4[%c3_69, %c0_70, %c0_71] : memref<8x8x128xf32, #tpu.memory_space<vmem>>, vector<1x8x128xf32>
    %159 = vector.shape_cast %158 : vector<1x8x128xf32> to vector<8x128xf32>
    %160 = vector.shape_cast %157 : vector<8x128xf32> to vector<1x8x128xf32>
    tpu.vector_store %arg4[%c3_69, %c0_70, %c0_71], %160 {strides = array<i32>} : memref<8x8x128xf32, #tpu.memory_space<vmem>>, vector<1x8x128xf32>,
    %c4 = arith.constant 4 : index
    %c0_72 = arith.constant 0 : index
    %c0_73 = arith.constant 0 : index
    %161 = vector.load %arg2[%c4, %c0_72, %c0_73] : memref<8x8x512xf32, #tpu.memory_space<vmem>>, vector<1x8x512xf32>
    %162 = vector.shape_cast %161 : vector<1x8x512xf32> to vector<8x512xf32>
    %c0_74 = arith.constant 0 : index
    %c0_75 = arith.constant 0 : index
    %163 = vector.load %arg5[%c0_74, %c0_75] : memref<128x512xf32, #tpu.memory_space<vmem>>, vector<128x512xf32>
    %cst_76 = arith.constant dense<0.000000e+00> : vector<8x512xf32>
    %164 = tpu.matmul %157, %163, %cst_76 {dimension_numbers = #tpu.dot_dimension_numbers<[1], [0], [0], [1], [0, 0, 1, 1], [], []>} : vector<8x128xf32>, vector<128x512xf32>, vector<8x512xf32> -> vector<8x512xf32>
    %165 = arith.addf %162, %164 : vector<8x512xf32>
    %166 = vector.extract_strided_slice %165 {offsets = [0, 0], sizes = [8, 128], strides = [1, 1]} : vector<8x512xf32> to vector<8x128xf32>
    %cst_77 = arith.constant 5.000000e-01 : f32
    %167 = vector.broadcast %cst_77 : f32 to vector<8x128xf32>
    %168 = arith.mulf %167, %166 : vector<8x128xf32>
    %169 = math.tanh %168 : vector<8x128xf32>
    %cst_78 = arith.constant 5.000000e-01 : f32
    %170 = vector.broadcast %cst_78 : f32 to vector<8x128xf32>
    %171 = arith.mulf %170, %169 : vector<8x128xf32>
    %cst_79 = arith.constant 5.000000e-01 : f32
    %172 = vector.broadcast %cst_79 : f32 to vector<8x128xf32>
    %173 = arith.addf %171, %172 : vector<8x128xf32>
    %174 = vector.extract_strided_slice %165 {offsets = [0, 128], sizes = [8, 128], strides = [1, 1]} : vector<8x512xf32> to vector<8x128xf32>
    %cst_80 = arith.constant 5.000000e-01 : f32
    %175 = vector.broadcast %cst_80 : f32 to vector<8x128xf32>
    %176 = arith.mulf %175, %174 : vector<8x128xf32>
    %177 = math.tanh %176 : vector<8x128xf32>
    %cst_81 = arith.constant 5.000000e-01 : f32
    %178 = vector.broadcast %cst_81 : f32 to vector<8x128xf32>
    %179 = arith.mulf %178, %177 : vector<8x128xf32>
    %cst_82 = arith.constant 5.000000e-01 : f32
    %180 = vector.broadcast %cst_82 : f32 to vector<8x128xf32>
    %181 = arith.addf %179, %180 : vector<8x128xf32>
    %182 = vector.extract_strided_slice %165 {offsets = [0, 256], sizes = [8, 128], strides = [1, 1]} : vector<8x512xf32> to vector<8x128xf32>
    %183 = math.tanh %182 : vector<8x128xf32>
    %184 = vector.extract_strided_slice %165 {offsets = [0, 384], sizes = [8, 128], strides = [1, 1]} : vector<8x512xf32> to vector<8x128xf32>
    %cst_83 = arith.constant 5.000000e-01 : f32
    %185 = vector.broadcast %cst_83 : f32 to vector<8x128xf32>
    %186 = arith.mulf %185, %184 : vector<8x128xf32>
    %187 = math.tanh %186 : vector<8x128xf32>
    %cst_84 = arith.constant 5.000000e-01 : f32
    %188 = vector.broadcast %cst_84 : f32 to vector<8x128xf32>
    %189 = arith.mulf %188, %187 : vector<8x128xf32>
    %cst_85 = arith.constant 5.000000e-01 : f32
    %190 = vector.broadcast %cst_85 : f32 to vector<8x128xf32>
    %191 = arith.addf %189, %190 : vector<8x128xf32>
    %192 = arith.mulf %173, %155 : vector<8x128xf32>
    %193 = arith.mulf %181, %183 : vector<8x128xf32>
    %194 = arith.addf %192, %193 : vector<8x128xf32>
    %195 = math.tanh %194 : vector<8x128xf32>
    %196 = arith.mulf %191, %195 : vector<8x128xf32>
    %c4_86 = arith.constant 4 : index
    %c0_87 = arith.constant 0 : index
    %c0_88 = arith.constant 0 : index
    %197 = vector.load %arg4[%c4_86, %c0_87, %c0_88] : memref<8x8x128xf32, #tpu.memory_space<vmem>>, vector<1x8x128xf32>
    %198 = vector.shape_cast %197 : vector<1x8x128xf32> to vector<8x128xf32>
    %199 = vector.shape_cast %196 : vector<8x128xf32> to vector<1x8x128xf32>
    tpu.vector_store %arg4[%c4_86, %c0_87, %c0_88], %199 {strides = array<i32>} : memref<8x8x128xf32, #tpu.memory_space<vmem>>, vector<1x8x128xf32>,
    %c5 = arith.constant 5 : index
    %c0_89 = arith.constant 0 : index
    %c0_90 = arith.constant 0 : index
    %200 = vector.load %arg2[%c5, %c0_89, %c0_90] : memref<8x8x512xf32, #tpu.memory_space<vmem>>, vector<1x8x512xf32>
    %201 = vector.shape_cast %200 : vector<1x8x512xf32> to vector<8x512xf32>
    %c0_91 = arith.constant 0 : index
    %c0_92 = arith.constant 0 : index
    %202 = vector.load %arg5[%c0_91, %c0_92] : memref<128x512xf32, #tpu.memory_space<vmem>>, vector<128x512xf32>
    %cst_93 = arith.constant dense<0.000000e+00> : vector<8x512xf32>
    %203 = tpu.matmul %196, %202, %cst_93 {dimension_numbers = #tpu.dot_dimension_numbers<[1], [0], [0], [1], [0, 0, 1, 1], [], []>} : vector<8x128xf32>, vector<128x512xf32>, vector<8x512xf32> -> vector<8x512xf32>
    %204 = arith.addf %201, %203 : vector<8x512xf32>
    %205 = vector.extract_strided_slice %204 {offsets = [0, 0], sizes = [8, 128], strides = [1, 1]} : vector<8x512xf32> to vector<8x128xf32>
    %cst_94 = arith.constant 5.000000e-01 : f32
    %206 = vector.broadcast %cst_94 : f32 to vector<8x128xf32>
    %207 = arith.mulf %206, %205 : vector<8x128xf32>
    %208 = math.tanh %207 : vector<8x128xf32>
    %cst_95 = arith.constant 5.000000e-01 : f32
    %209 = vector.broadcast %cst_95 : f32 to vector<8x128xf32>
    %210 = arith.mulf %209, %208 : vector<8x128xf32>
    %cst_96 = arith.constant 5.000000e-01 : f32
    %211 = vector.broadcast %cst_96 : f32 to vector<8x128xf32>
    %212 = arith.addf %210, %211 : vector<8x128xf32>
    %213 = vector.extract_strided_slice %204 {offsets = [0, 128], sizes = [8, 128], strides = [1, 1]} : vector<8x512xf32> to vector<8x128xf32>
    %cst_97 = arith.constant 5.000000e-01 : f32
    %214 = vector.broadcast %cst_97 : f32 to vector<8x128xf32>
    %215 = arith.mulf %214, %213 : vector<8x128xf32>
    %216 = math.tanh %215 : vector<8x128xf32>
    %cst_98 = arith.constant 5.000000e-01 : f32
    %217 = vector.broadcast %cst_98 : f32 to vector<8x128xf32>
    %218 = arith.mulf %217, %216 : vector<8x128xf32>
    %cst_99 = arith.constant 5.000000e-01 : f32
    %219 = vector.broadcast %cst_99 : f32 to vector<8x128xf32>
    %220 = arith.addf %218, %219 : vector<8x128xf32>
    %221 = vector.extract_strided_slice %204 {offsets = [0, 256], sizes = [8, 128], strides = [1, 1]} : vector<8x512xf32> to vector<8x128xf32>
    %222 = math.tanh %221 : vector<8x128xf32>
    %223 = vector.extract_strided_slice %204 {offsets = [0, 384], sizes = [8, 128], strides = [1, 1]} : vector<8x512xf32> to vector<8x128xf32>
    %cst_100 = arith.constant 5.000000e-01 : f32
    %224 = vector.broadcast %cst_100 : f32 to vector<8x128xf32>
    %225 = arith.mulf %224, %223 : vector<8x128xf32>
    %226 = math.tanh %225 : vector<8x128xf32>
    %cst_101 = arith.constant 5.000000e-01 : f32
    %227 = vector.broadcast %cst_101 : f32 to vector<8x128xf32>
    %228 = arith.mulf %227, %226 : vector<8x128xf32>
    %cst_102 = arith.constant 5.000000e-01 : f32
    %229 = vector.broadcast %cst_102 : f32 to vector<8x128xf32>
    %230 = arith.addf %228, %229 : vector<8x128xf32>
    %231 = arith.mulf %212, %194 : vector<8x128xf32>
    %232 = arith.mulf %220, %222 : vector<8x128xf32>
    %233 = arith.addf %231, %232 : vector<8x128xf32>
    %234 = math.tanh %233 : vector<8x128xf32>
    %235 = arith.mulf %230, %234 : vector<8x128xf32>
    %c5_103 = arith.constant 5 : index
    %c0_104 = arith.constant 0 : index
    %c0_105 = arith.constant 0 : index
    %236 = vector.load %arg4[%c5_103, %c0_104, %c0_105] : memref<8x8x128xf32, #tpu.memory_space<vmem>>, vector<1x8x128xf32>
    %237 = vector.shape_cast %236 : vector<1x8x128xf32> to vector<8x128xf32>
    %238 = vector.shape_cast %235 : vector<8x128xf32> to vector<1x8x128xf32>
    tpu.vector_store %arg4[%c5_103, %c0_104, %c0_105], %238 {strides = array<i32>} : memref<8x8x128xf32, #tpu.memory_space<vmem>>, vector<1x8x128xf32>,
    %c6 = arith.constant 6 : index
    %c0_106 = arith.constant 0 : index
    %c0_107 = arith.constant 0 : index
    %239 = vector.load %arg2[%c6, %c0_106, %c0_107] : memref<8x8x512xf32, #tpu.memory_space<vmem>>, vector<1x8x512xf32>
    %240 = vector.shape_cast %239 : vector<1x8x512xf32> to vector<8x512xf32>
    %c0_108 = arith.constant 0 : index
    %c0_109 = arith.constant 0 : index
    %241 = vector.load %arg5[%c0_108, %c0_109] : memref<128x512xf32, #tpu.memory_space<vmem>>, vector<128x512xf32>
    %cst_110 = arith.constant dense<0.000000e+00> : vector<8x512xf32>
    %242 = tpu.matmul %235, %241, %cst_110 {dimension_numbers = #tpu.dot_dimension_numbers<[1], [0], [0], [1], [0, 0, 1, 1], [], []>} : vector<8x128xf32>, vector<128x512xf32>, vector<8x512xf32> -> vector<8x512xf32>
    %243 = arith.addf %240, %242 : vector<8x512xf32>
    %244 = vector.extract_strided_slice %243 {offsets = [0, 0], sizes = [8, 128], strides = [1, 1]} : vector<8x512xf32> to vector<8x128xf32>
    %cst_111 = arith.constant 5.000000e-01 : f32
    %245 = vector.broadcast %cst_111 : f32 to vector<8x128xf32>
    %246 = arith.mulf %245, %244 : vector<8x128xf32>
    %247 = math.tanh %246 : vector<8x128xf32>
    %cst_112 = arith.constant 5.000000e-01 : f32
    %248 = vector.broadcast %cst_112 : f32 to vector<8x128xf32>
    %249 = arith.mulf %248, %247 : vector<8x128xf32>
    %cst_113 = arith.constant 5.000000e-01 : f32
    %250 = vector.broadcast %cst_113 : f32 to vector<8x128xf32>
    %251 = arith.addf %249, %250 : vector<8x128xf32>
    %252 = vector.extract_strided_slice %243 {offsets = [0, 128], sizes = [8, 128], strides = [1, 1]} : vector<8x512xf32> to vector<8x128xf32>
    %cst_114 = arith.constant 5.000000e-01 : f32
    %253 = vector.broadcast %cst_114 : f32 to vector<8x128xf32>
    %254 = arith.mulf %253, %252 : vector<8x128xf32>
    %255 = math.tanh %254 : vector<8x128xf32>
    %cst_115 = arith.constant 5.000000e-01 : f32
    %256 = vector.broadcast %cst_115 : f32 to vector<8x128xf32>
    %257 = arith.mulf %256, %255 : vector<8x128xf32>
    %cst_116 = arith.constant 5.000000e-01 : f32
    %258 = vector.broadcast %cst_116 : f32 to vector<8x128xf32>
    %259 = arith.addf %257, %258 : vector<8x128xf32>
    %260 = vector.extract_strided_slice %243 {offsets = [0, 256], sizes = [8, 128], strides = [1, 1]} : vector<8x512xf32> to vector<8x128xf32>
    %261 = math.tanh %260 : vector<8x128xf32>
    %262 = vector.extract_strided_slice %243 {offsets = [0, 384], sizes = [8, 128], strides = [1, 1]} : vector<8x512xf32> to vector<8x128xf32>
    %cst_117 = arith.constant 5.000000e-01 : f32
    %263 = vector.broadcast %cst_117 : f32 to vector<8x128xf32>
    %264 = arith.mulf %263, %262 : vector<8x128xf32>
    %265 = math.tanh %264 : vector<8x128xf32>
    %cst_118 = arith.constant 5.000000e-01 : f32
    %266 = vector.broadcast %cst_118 : f32 to vector<8x128xf32>
    %267 = arith.mulf %266, %265 : vector<8x128xf32>
    %cst_119 = arith.constant 5.000000e-01 : f32
    %268 = vector.broadcast %cst_119 : f32 to vector<8x128xf32>
    %269 = arith.addf %267, %268 : vector<8x128xf32>
    %270 = arith.mulf %251, %233 : vector<8x128xf32>
    %271 = arith.mulf %259, %261 : vector<8x128xf32>
    %272 = arith.addf %270, %271 : vector<8x128xf32>
    %273 = math.tanh %272 : vector<8x128xf32>
    %274 = arith.mulf %269, %273 : vector<8x128xf32>
    %c6_120 = arith.constant 6 : index
    %c0_121 = arith.constant 0 : index
    %c0_122 = arith.constant 0 : index
    %275 = vector.load %arg4[%c6_120, %c0_121, %c0_122] : memref<8x8x128xf32, #tpu.memory_space<vmem>>, vector<1x8x128xf32>
    %276 = vector.shape_cast %275 : vector<1x8x128xf32> to vector<8x128xf32>
    %277 = vector.shape_cast %274 : vector<8x128xf32> to vector<1x8x128xf32>
    tpu.vector_store %arg4[%c6_120, %c0_121, %c0_122], %277 {strides = array<i32>} : memref<8x8x128xf32, #tpu.memory_space<vmem>>, vector<1x8x128xf32>,
    %c7 = arith.constant 7 : index
    %c0_123 = arith.constant 0 : index
    %c0_124 = arith.constant 0 : index
    %278 = vector.load %arg2[%c7, %c0_123, %c0_124] : memref<8x8x512xf32, #tpu.memory_space<vmem>>, vector<1x8x512xf32>
    %279 = vector.shape_cast %278 : vector<1x8x512xf32> to vector<8x512xf32>
    %c0_125 = arith.constant 0 : index
    %c0_126 = arith.constant 0 : index
    %280 = vector.load %arg5[%c0_125, %c0_126] : memref<128x512xf32, #tpu.memory_space<vmem>>, vector<128x512xf32>
    %cst_127 = arith.constant dense<0.000000e+00> : vector<8x512xf32>
    %281 = tpu.matmul %274, %280, %cst_127 {dimension_numbers = #tpu.dot_dimension_numbers<[1], [0], [0], [1], [0, 0, 1, 1], [], []>} : vector<8x128xf32>, vector<128x512xf32>, vector<8x512xf32> -> vector<8x512xf32>
    %282 = arith.addf %279, %281 : vector<8x512xf32>
    %283 = vector.extract_strided_slice %282 {offsets = [0, 0], sizes = [8, 128], strides = [1, 1]} : vector<8x512xf32> to vector<8x128xf32>
    %cst_128 = arith.constant 5.000000e-01 : f32
    %284 = vector.broadcast %cst_128 : f32 to vector<8x128xf32>
    %285 = arith.mulf %284, %283 : vector<8x128xf32>
    %286 = math.tanh %285 : vector<8x128xf32>
    %cst_129 = arith.constant 5.000000e-01 : f32
    %287 = vector.broadcast %cst_129 : f32 to vector<8x128xf32>
    %288 = arith.mulf %287, %286 : vector<8x128xf32>
    %cst_130 = arith.constant 5.000000e-01 : f32
    %289 = vector.broadcast %cst_130 : f32 to vector<8x128xf32>
    %290 = arith.addf %288, %289 : vector<8x128xf32>
    %291 = vector.extract_strided_slice %282 {offsets = [0, 128], sizes = [8, 128], strides = [1, 1]} : vector<8x512xf32> to vector<8x128xf32>
    %cst_131 = arith.constant 5.000000e-01 : f32
    %292 = vector.broadcast %cst_131 : f32 to vector<8x128xf32>
    %293 = arith.mulf %292, %291 : vector<8x128xf32>
    %294 = math.tanh %293 : vector<8x128xf32>
    %cst_132 = arith.constant 5.000000e-01 : f32
    %295 = vector.broadcast %cst_132 : f32 to vector<8x128xf32>
    %296 = arith.mulf %295, %294 : vector<8x128xf32>
    %cst_133 = arith.constant 5.000000e-01 : f32
    %297 = vector.broadcast %cst_133 : f32 to vector<8x128xf32>
    %298 = arith.addf %296, %297 : vector<8x128xf32>
    %299 = vector.extract_strided_slice %282 {offsets = [0, 256], sizes = [8, 128], strides = [1, 1]} : vector<8x512xf32> to vector<8x128xf32>
    %300 = math.tanh %299 : vector<8x128xf32>
    %301 = vector.extract_strided_slice %282 {offsets = [0, 384], sizes = [8, 128], strides = [1, 1]} : vector<8x512xf32> to vector<8x128xf32>
    %cst_134 = arith.constant 5.000000e-01 : f32
    %302 = vector.broadcast %cst_134 : f32 to vector<8x128xf32>
    %303 = arith.mulf %302, %301 : vector<8x128xf32>
    %304 = math.tanh %303 : vector<8x128xf32>
    %cst_135 = arith.constant 5.000000e-01 : f32
    %305 = vector.broadcast %cst_135 : f32 to vector<8x128xf32>
    %306 = arith.mulf %305, %304 : vector<8x128xf32>
    %cst_136 = arith.constant 5.000000e-01 : f32
    %307 = vector.broadcast %cst_136 : f32 to vector<8x128xf32>
    %308 = arith.addf %306, %307 : vector<8x128xf32>
    %309 = arith.mulf %290, %272 : vector<8x128xf32>
    %310 = arith.mulf %298, %300 : vector<8x128xf32>
    %311 = arith.addf %309, %310 : vector<8x128xf32>
    %312 = math.tanh %311 : vector<8x128xf32>
    %313 = arith.mulf %308, %312 : vector<8x128xf32>
    %c7_137 = arith.constant 7 : index
    %c0_138 = arith.constant 0 : index
    %c0_139 = arith.constant 0 : index
    %314 = vector.load %arg4[%c7_137, %c0_138, %c0_139] : memref<8x8x128xf32, #tpu.memory_space<vmem>>, vector<1x8x128xf32>
    %315 = vector.shape_cast %314 : vector<1x8x128xf32> to vector<8x128xf32>
    %316 = vector.shape_cast %313 : vector<8x128xf32> to vector<1x8x128xf32>
    tpu.vector_store %arg4[%c7_137, %c0_138, %c0_139], %316 {strides = array<i32>} : memref<8x8x128xf32, #tpu.memory_space<vmem>>, vector<1x8x128xf32>,
    %c0_140 = arith.constant 0 : index
    %c0_141 = arith.constant 0 : index
    %317 = vector.load %arg7[%c0_140, %c0_141] : memref<8x128xf32, #tpu.memory_space<vmem>>, vector<8x128xf32>
    tpu.vector_store %arg7[%c0_140, %c0_141], %311 {strides = array<i32>} : memref<8x128xf32, #tpu.memory_space<vmem>>, vector<8x128xf32>,
    %c0_142 = arith.constant 0 : index
    %c0_143 = arith.constant 0 : index
    %318 = vector.load %arg8[%c0_142, %c0_143] : memref<8x128xf32, #tpu.memory_space<vmem>>, vector<8x128xf32>
    tpu.vector_store %arg8[%c0_142, %c0_143], %313 {strides = array<i32>} : memref<8x128xf32, #tpu.memory_space<vmem>>, vector<8x128xf32>,
    return
  }
  func.func @transform_0(%arg0: i32, %arg1: i32) -> (i32, i32, i32) {
    %c0_i32 = arith.constant 0 : i32
    %c0_i32_0 = arith.constant 0 : i32
    return %arg1, %arg0, %c0_i32 : i32, i32, i32
  }
  func.func @transform_2(%arg0: i32, %arg1: i32) -> (i32, i32, i32) {
    %c0_i32 = arith.constant 0 : i32
    %c0_i32_0 = arith.constant 0 : i32
    return %arg1, %arg0, %c0_i32 : i32, i32, i32
  }
}

</mosaic_0001>

<bundles_post_ra>
// kernel: _lambda_.1
= control target key start
LH: loop header
LB: loop body
LE: loop exit
PB: predicated region body
PF: predicated region fallthrough
CT: control target
= control target key end

     0   :  { %s3217_s0 = inlined_call_operand.vmem [shape: f32[8,8,512], index: 0, kind: input, shape index: {}]   ;;  %s3218_s1 = inlined_call_operand.vmem [shape: f32[128,512], index: 1, kind: input, shape index: {}]   ;;  %s3219_s2 = inlined_call_operand.vmem [shape: f32[8,8,128], index: 2, kind: output, shape index: {}]  }
   0x1   :  { %v2226_v0 = vld [vmem:[%s3218_s1] sm:$0xff]  ;;  %v2231_v1 = vld [vmem:[%s3218_s1 + $0x8] sm:$0xff]  ;;  %v2236_v2 = vld [vmem:[%s3218_s1 + $0x10] sm:$0xff] }
   0x2   :  { %3266 = vst [vmem:[#allocation8_spill] sm:$0xff] %v2226_v0  ;;  %3267 = vst [vmem:[#allocation9_spill] sm:$0xff] %v2231_v1  ;;  %v2241_v3 = vld [vmem:[%s3218_s1 + $0x18] sm:$0xff]  ;;  %v2246_v4 = vld [vmem:[%s3218_s1 + $0x20] sm:$0xff] }
   0x3   :  { %3268 = vst [vmem:[#allocation10_spill] sm:$0xff] %v2236_v2  ;;  %3269 = vst [vmem:[#allocation11_spill] sm:$0xff] %v2241_v3  ;;  %v2251_v5 = vld [vmem:[%s3218_s1 + $0x28] sm:$0xff]  ;;  %v2256_v6 = vld [vmem:[%s3218_s1 + $0x30] sm:$0xff] }
   0x4   :  { %3270 = vst [vmem:[#allocation12_spill] sm:$0xff] %v2246_v4  ;;  %3271 = vst [vmem:[#allocation13_spill] sm:$0xff] %v2251_v5  ;;  %v2261_v7 = vld [vmem:[%s3218_s1 + $0x38] sm:$0xff]  ;;  %v2266_v8 = vld [vmem:[%s3218_s1 + $0x40] sm:$0xff] }
   0x5   :  { %3272 = vst [vmem:[#allocation14_spill] sm:$0xff] %v2256_v6  ;;  %3273 = vst [vmem:[#allocation15_spill] sm:$0xff] %v2261_v7  ;;  %v2271_v9 = vld [vmem:[%s3218_s1 + $0x48] sm:$0xff]  ;;  %v2276_v10 = vld [vmem:[%s3218_s1 + $0x50] sm:$0xff] }
   0x6   :  { %3274 = vst [vmem:[#allocation16_spill] sm:$0xff] %v2266_v8  ;;  %3275 = vst [vmem:[#allocation17_spill] sm:$0xff] %v2271_v9  ;;  %v2281_v11 = vld [vmem:[%s3218_s1 + $0x58] sm:$0xff]  ;;  %v2286_v12 = vld [vmem:[%s3218_s1 + $0x60] sm:$0xff] }
   0x7   :  { %3276 = vst [vmem:[#allocation18_spill] sm:$0xff] %v2276_v10  ;;  %3277 = vst [vmem:[#allocation19_spill] sm:$0xff] %v2281_v11  ;;  %v2291_v13 = vld [vmem:[%s3218_s1 + $0x68] sm:$0xff]  ;;  %v2296_v14 = vld [vmem:[%s3218_s1 + $0x70] sm:$0xff] }
   0x8   :  { %3278 = vst [vmem:[#allocation20_spill] sm:$0xff] %v2286_v12  ;;  %3279 = vst [vmem:[#allocation21_spill] sm:$0xff] %v2291_v13  ;;  %v2301_v15 = vld [vmem:[%s3218_s1 + $0x78] sm:$0xff]  ;;  %v2306_v16 = vld [vmem:[%s3218_s1 + $0x80] sm:$0xff] }
   0x9   :  { %3280 = vst [vmem:[#allocation22_spill] sm:$0xff] %v2296_v14  ;;  %3281 = vst [vmem:[#allocation23_spill] sm:$0xff] %v2301_v15  ;;  %v2311_v17 = vld [vmem:[%s3218_s1 + $0x88] sm:$0xff]  ;;  %v2316_v18 = vld [vmem:[%s3218_s1 + $0x90] sm:$0xff] }
   0xa   :  { %v2321_v19 = vld [vmem:[%s3218_s1 + $0x98] sm:$0xff]  ;;  %v2326_v20 = vld [vmem:[%s3218_s1 + $0xa0] sm:$0xff]  ;;  %v2331_v21 = vld [vmem:[%s3218_s1 + $0xa8] sm:$0xff] }
   0xb   :  { %3282 = vst [vmem:[#allocation24_spill] sm:$0xff] %v2331_v21  ;;  %v2336_v22 = vld [vmem:[%s3218_s1 + $0xb0] sm:$0xff]  ;;  %v2341_v23 = vld [vmem:[%s3218_s1 + $0xb8] sm:$0xff]  ;;  %v2346_v24 = vld [vmem:[%s3218_s1 + $0xc0] sm:$0xff] }
   0xc   :  { %v2351_v25 = vld [vmem:[%s3218_s1 + $0xc8] sm:$0xff]  ;;  %v2356_v26 = vld [vmem:[%s3218_s1 + $0xd0] sm:$0xff]  ;;  %v2361_v27 = vld [vmem:[%s3218_s1 + $0xd8] sm:$0xff] }
   0xd   :  { %v2366_v28 = vld [vmem:[%s3218_s1 + $0xe0] sm:$0xff]  ;;  %v2371_v29 = vld [vmem:[%s3218_s1 + $0xe8] sm:$0xff]  ;;  %v2376_v30 = vld [vmem:[%s3218_s1 + $0xf0] sm:$0xff] }
   0xe   :  { %v2381_v31 = vld [vmem:[%s3218_s1 + $0xf8] sm:$0xff]  ;;  %v2386_v32 = vld [vmem:[%s3218_s1 + $0x100] sm:$0xff]  ;;  %v2391_v33 = vld [vmem:[%s3218_s1 + $0x108] sm:$0xff] }
   0xf   :  { %v2396_v34 = vld [vmem:[%s3218_s1 + $0x110] sm:$0xff]  ;;  %v2401_v35 = vld [vmem:[%s3218_s1 + $0x118] sm:$0xff]  ;;  %v2406_v36 = vld [vmem:[%s3218_s1 + $0x120] sm:$0xff] }
  0x10   :  { %v2411_v37 = vld [vmem:[%s3218_s1 + $0x128] sm:$0xff]  ;;  %v2416_v38 = vld [vmem:[%s3218_s1 + $0x130] sm:$0xff]  ;;  %v2421_v39 = vld [vmem:[%s3218_s1 + $0x138] sm:$0xff] }
  0x11   :  { %v2426_v40 = vld [vmem:[%s3218_s1 + $0x140] sm:$0xff]  ;;  %v2431_v41 = vld [vmem:[%s3218_s1 + $0x148] sm:$0xff]  ;;  %v2436_v42 = vld [vmem:[%s3218_s1 + $0x150] sm:$0xff] }
  0x12   :  { %v2441_v43 = vld [vmem:[%s3218_s1 + $0x158] sm:$0xff]  ;;  %v2446_v44 = vld [vmem:[%s3218_s1 + $0x160] sm:$0xff]  ;;  %v2451_v45 = vld [vmem:[%s3218_s1 + $0x168] sm:$0xff] }
  0x13   :  { %v2456_v46 = vld [vmem:[%s3218_s1 + $0x170] sm:$0xff]  ;;  %v2461_v47 = vld [vmem:[%s3218_s1 + $0x178] sm:$0xff]  ;;  %v2466_v48 = vld [vmem:[%s3218_s1 + $0x180] sm:$0xff] }
  0x14   :  { %v2471_v49 = vld [vmem:[%s3218_s1 + $0x188] sm:$0xff]  ;;  %v2476_v50 = vld [vmem:[%s3218_s1 + $0x190] sm:$0xff]  ;;  %v2481_v51 = vld [vmem:[%s3218_s1 + $0x198] sm:$0xff] }
  0x15   :  { %v2486_v52 = vld [vmem:[%s3218_s1 + $0x1a0] sm:$0xff]  ;;  %v2491_v53 = vld [vmem:[%s3218_s1 + $0x1a8] sm:$0xff]  ;;  %v2496_v54 = vld [vmem:[%s3218_s1 + $0x1b0] sm:$0xff] }
  0x16   :  { %v2501_v55 = vld [vmem:[%s3218_s1 + $0x1b8] sm:$0xff]  ;;  %v2506_v56 = vld [vmem:[%s3218_s1 + $0x1c0] sm:$0xff]  ;;  %v2511_v57 = vld [vmem:[%s3218_s1 + $0x1c8] sm:$0xff] }
  0x17   :  { %v2516_v58 = vld [vmem:[%s3218_s1 + $0x1d0] sm:$0xff]  ;;  %v2521_v59 = vld [vmem:[%s3218_s1 + $0x1d8] sm:$0xff]  ;;  %v2526_v60 = vld [vmem:[%s3218_s1 + $0x1e0] sm:$0xff] }
  0x18   :  { %v2531_v61 = vld [vmem:[%s3218_s1 + $0x1e8] sm:$0xff]  ;;  %v2536_v62 = vld [vmem:[%s3218_s1 + $0x1f0] sm:$0xff]  ;;  %v2541_v63 = vld [vmem:[%s3218_s1 + $0x1f8] sm:$0xff] }
  0x19   :  { %3283 = vst [vmem:[#allocation25_spill] sm:$0xff] %v2531_v61  ;;  %3284 = vst [vmem:[#allocation26_spill] sm:$0xff] %v2541_v63 }
  0x1a   :  { %181 = vsyncadd [#allocation3], 8192  ;;  %258 = vmatprep.subr.mxu0 %v2531_v61  ;;  %329 = vmatprep.subr.mxu1 %v2541_v63 }
  0x1b   :  { %2205 = dma.done.wait [#allocation3], 8192 }
  0x1c   :  { %2206 = vsyncadd [#allocation3], 4294959104  ;;  %259 = vmatpush1.msra.mxu0 %v2526_v60  ;;  %330 = vmatpush1.msra.mxu1 %v2536_v62 }
  0x1d   :  { %260 = vmatprep.subr.mxu0 %v2511_v57  ;;  %331 = vmatprep.subr.mxu1 %v2521_v59 }
  0x1e   :  { %261 = vmatpush1.msra.mxu0 %v2506_v56  ;;  %332 = vmatpush1.msra.mxu1 %v2516_v58 }
  0x1f   :  { %262 = vmatprep.subr.mxu0 %v2491_v53  ;;  %333 = vmatprep.subr.mxu1 %v2501_v55 }
  0x20   :  { %263 = vmatpush1.msra.mxu0 %v2486_v52  ;;  %334 = vmatpush1.msra.mxu1 %v2496_v54 }
  0x21   :  { %264 = vmatprep.subr.mxu0 %v2471_v49  ;;  %335 = vmatprep.subr.mxu1 %v2481_v51 }
  0x22   :  { %265 = vmatpush1.msra.mxu0 %v2466_v48  ;;  %336 = vmatpush1.msra.mxu1 %v2476_v50 }
  0x23   :  { %266 = vmatprep.subr.mxu0 %v2451_v45  ;;  %337 = vmatprep.subr.mxu1 %v2461_v47 }
  0x24   :  { %267 = vmatpush1.msra.mxu0 %v2446_v44  ;;  %338 = vmatpush1.msra.mxu1 %v2456_v46 }
  0x25   :  { %268 = vmatprep.subr.mxu0 %v2431_v41  ;;  %339 = vmatprep.subr.mxu1 %v2441_v43 }
  0x26   :  { %269 = vmatpush1.msra.mxu0 %v2426_v40  ;;  %340 = vmatpush1.msra.mxu1 %v2436_v42 }
  0x27   :  { %270 = vmatprep.subr.mxu0 %v2411_v37  ;;  %341 = vmatprep.subr.mxu1 %v2421_v39 }
  0x28   :  { %271 = vmatpush1.msra.mxu0 %v2406_v36  ;;  %342 = vmatpush1.msra.mxu1 %v2416_v38 }
  0x29   :  { %272 = vmatprep.subr.mxu0 %v2391_v33  ;;  %343 = vmatprep.subr.mxu1 %v2401_v35 }
  0x2a   :  { %273 = vmatpush1.msra.mxu0 %v2386_v32  ;;  %344 = vmatpush1.msra.mxu1 %v2396_v34 }
  0x2b   :  { %274 = vmatprep.subr.mxu0 %v2371_v29  ;;  %345 = vmatprep.subr.mxu1 %v2381_v31 }
  0x2c   :  { %275 = vmatpush1.msra.mxu0 %v2366_v28  ;;  %346 = vmatpush1.msra.mxu1 %v2376_v30 }
  0x2d   :  { %276 = vmatprep.subr.mxu0 %v2351_v25  ;;  %347 = vmatprep.subr.mxu1 %v2361_v27 }
  0x2e   :  { %277 = vmatpush1.msra.mxu0 %v2346_v24  ;;  %348 = vmatpush1.msra.mxu1 %v2356_v26 }
  0x2f   :  { %278 = vmatprep.subr.mxu0 %v2331_v21  ;;  %349 = vmatprep.subr.mxu1 %v2341_v23  ;;  %v3222_v21 = vmov 0.0  }
  0x30   :  { %279 = vmatpush1.msra.mxu0 %v2326_v20  ;;  %350 = vmatpush1.msra.mxu1 %v2336_v22 }
  0x31   :  { %280 = vmatprep.subr.mxu0 %v2311_v17  ;;  %351 = vmatprep.subr.mxu1 %v2321_v19 }
  0x32   :  { %281 = vmatpush1.msra.mxu0 %v2306_v16  ;;  %352 = vmatpush1.msra.mxu1 %v2316_v18 }
  0x33   :  { %282 = vmatprep.subr.mxu0 %v2291_v13  ;;  %353 = vmatprep.subr.mxu1 %v2301_v15 }
  0x34   :  { %283 = vmatpush1.msra.mxu0 %v2286_v12  ;;  %322 = vmatprep.mubr.f32.mxu0 %v3222_v21 }
  0x35   :  { %284 = vmatprep.subr.mxu0 %v2271_v9  ;;  %354 = vmatpush1.msra.mxu1 %v2296_v14 }
  0x36   :  { %285 = vmatpush1.msra.mxu0 %v2266_v8  ;;  %355 = vmatprep.subr.mxu1 %v2281_v11 }
  0x37   :  { %286 = vmatprep.subr.mxu0 %v2251_v5  ;;  %356 = vmatpush1.msra.mxu1 %v2276_v10 }
  0x38   :  { %287 = vmatpush1.msra.mxu0 %v2246_v4  ;;  %357 = vmatprep.subr.mxu1 %v2261_v7 }
  0x39   :  { %288 = vmatprep.subr.mxu0 %v2231_v1  ;;  %358 = vmatpush1.msra.mxu1 %v2256_v6 }
  0x3a   :  { %289 = vmatpush1.msra.mxu0 %v2226_v0  ;;  %359 = vmatprep.subr.mxu1 %v2241_v3 }
  0x3b   :  { %323 = vmatmul.mubr.f32.vlgmr.msra.gmra.mxu0 %v3222_v21  ;;  %360 = vmatpush1.msra.mxu1 %v2236_v2 }
  0x3c   :  { %393 = vmatprep.mubr.f32.mxu1 %v3222_v21  ;;  %492 = vmatprep.subr.mxu0 %v2531_v61 }
  0x3d   :  { %394 = vmatmul.mubr.f32.vlgmr.msra.gmra.mxu1 %v3222_v21  ;;  %563 = vmatprep.subr.mxu1 %v2541_v63  ;;  %v3285_v21 = vld [vmem:[#allocation24_spill] sm:$0xff] }
  0x3e   :  { %493 = vmatpush1.msra.mxu0 %v2526_v60  ;;  %564 = vmatpush1.msra.mxu1 %v2536_v62 }
  0x3f   :  { %494 = vmatprep.subr.mxu0 %v2511_v57  ;;  %565 = vmatprep.subr.mxu1 %v2521_v59 }
  0x40   :  { %495 = vmatpush1.msra.mxu0 %v2506_v56  ;;  %566 = vmatpush1.msra.mxu1 %v2516_v58 }
  0x41   :  { %496 = vmatprep.subr.mxu0 %v2491_v53  ;;  %567 = vmatprep.subr.mxu1 %v2501_v55 }
  0x42   :  { %497 = vmatpush1.msra.mxu0 %v2486_v52  ;;  %568 = vmatpush1.msra.mxu1 %v2496_v54 }
  0x43   :  { %498 = vmatprep.subr.mxu0 %v2471_v49  ;;  %569 = vmatprep.subr.mxu1 %v2481_v51 }
  0x44   :  { %499 = vmatpush1.msra.mxu0 %v2466_v48  ;;  %570 = vmatpush1.msra.mxu1 %v2476_v50 }
  0x45   :  { %500 = vmatprep.subr.mxu0 %v2451_v45  ;;  %571 = vmatprep.subr.mxu1 %v2461_v47 }
  0x46   :  { %501 = vmatpush1.msra.mxu0 %v2446_v44  ;;  %572 = vmatpush1.msra.mxu1 %v2456_v46 }
  0x47   :  { %502 = vmatprep.subr.mxu0 %v2431_v41  ;;  %573 = vmatprep.subr.mxu1 %v2441_v43 }
  0x48   :  { %503 = vmatpush1.msra.mxu0 %v2426_v40  ;;  %574 = vmatpush1.msra.mxu1 %v2436_v42 }
  0x49   :  { %504 = vmatprep.subr.mxu0 %v2411_v37  ;;  %575 = vmatprep.subr.mxu1 %v2421_v39 }
  0x4a   :  { %505 = vmatpush1.msra.mxu0 %v2406_v36  ;;  %576 = vmatpush1.msra.mxu1 %v2416_v38 }
  0x4b   :  { %506 = vmatprep.subr.mxu0 %v2391_v33  ;;  %577 = vmatprep.subr.mxu1 %v2401_v35 }
  0x4c   :  { %507 = vmatpush1.msra.mxu0 %v2386_v32  ;;  %578 = vmatpush1.msra.mxu1 %v2396_v34 }
  0x4d   :  { %508 = vmatprep.subr.mxu0 %v2371_v29  ;;  %579 = vmatprep.subr.mxu1 %v2381_v31 }
  0x4e   :  { %509 = vmatpush1.msra.mxu0 %v2366_v28  ;;  %580 = vmatpush1.msra.mxu1 %v2376_v30 }
  0x4f   :  { %510 = vmatprep.subr.mxu0 %v2351_v25  ;;  %581 = vmatprep.subr.mxu1 %v2361_v27 }
  0x50   :  { %511 = vmatpush1.msra.mxu0 %v2346_v24  ;;  %582 = vmatpush1.msra.mxu1 %v2356_v26 }
  0x51   :  { %512 = vmatprep.subr.mxu0 %v3285_v21  ;;  %583 = vmatprep.subr.mxu1 %v2341_v23 }
  0x52   :  { %513 = vmatpush1.msra.mxu0 %v2326_v20  ;;  %584 = vmatpush1.msra.mxu1 %v2336_v22 }
  0x53   :  { %514 = vmatprep.subr.mxu0 %v2311_v17  ;;  %585 = vmatprep.subr.mxu1 %v2321_v19 }
  0x54   :  { %515 = vmatpush1.msra.mxu0 %v2306_v16  ;;  %586 = vmatpush1.msra.mxu1 %v2316_v18 }
  0x55   :  { %516 = vmatprep.subr.mxu0 %v2291_v13  ;;  %587 = vmatprep.subr.mxu1 %v2301_v15 }
  0x56   :  { %517 = vmatpush1.msra.mxu0 %v2286_v12  ;;  %588 = vmatpush1.msra.mxu1 %v2296_v14 }
  0x57   :  { %518 = vmatprep.subr.mxu0 %v2271_v9  ;;  %589 = vmatprep.subr.mxu1 %v2281_v11  ;;  %v3286_v9 = vmov 0.0  }
  0x58   :  { %519 = vmatpush1.msra.mxu0 %v2266_v8  ;;  %590 = vmatpush1.msra.mxu1 %v2276_v10  ;;  %v193_v10 = vld [vmem:[%s3217_s0 + $0x18] sm:$0xff] }
  0x59   :  { %520 = vmatprep.subr.mxu0 %v2251_v5  ;;  %591 = vmatprep.subr.mxu1 %v2261_v7 }
  0x5a   :  { %521 = vmatpush1.msra.mxu0 %v2246_v4  ;;  %592 = vmatpush1.msra.mxu1 %v2256_v6  ;;  %v190_v6 = vld [vmem:[%s3217_s0] sm:$0xff] }
  0x5b   :  { %522 = vmatprep.subr.mxu0 %v2231_v1  ;;  %593 = vmatprep.subr.mxu1 %v2241_v3  ;;  %v191_v3 = vld [vmem:[%s3217_s0 + $0x8] sm:$0xff] }
  0x5c   :  { %523 = vmatpush1.msra.mxu0 %v2226_v0  ;;  %556 = vmatprep.mubr.f32.mxu0 %v3286_v9 }
  0x5d   :  { %594 = vmatpush1.msra.mxu1 %v2236_v2  ;;  %627 = vmatprep.mubr.f32.mxu1 %v3286_v9  ;;  %v192_v2 = vld [vmem:[%s3217_s0 + $0x10] sm:$0xff] }
  0x5e   :  { %727 = vmatprep.subr.mxu0 %v2531_v61  ;;  %798 = vmatprep.subr.mxu1 %v2541_v63 }
  0xfb   :  { %v324_v4 = vpop.f32.mrf.mxu0 }
  0xfc   :  { %v400_v0 = vadd.f32 %v324_v4, %v190_v6 }
  0xfd   :  { %v326_v1 = vpop.f32.mrf.mxu0  ;;  %v395_v61 = vpop.f32.mrf.mxu1 }
  0xfe   :  { %v404_v9 = vmul.f32 0.5, %v400_v0  ;;  %v401_v7 = vadd.f32 %v326_v1, %v191_v3  ;;  %v402_v5 = vadd.f32 %v395_v61, %v192_v2 }
  0xff   :  { %v397_v8 = vpop.f32.mrf.mxu1 }
 0x100   :  { %2125 = vtanh.f32 %v404_v9  ;;  %v408_v63 = vmul.f32 0.5, %v401_v7  ;;  %v403_v11 = vadd.f32 %v397_v8, %v193_v10  ;;  %v3287_v10 = vld [vmem:[#allocation21_spill] sm:$0xff] }
 0x102   :  { %2127 = vtanh.f32 %v408_v63  ;;  %v413_v4 = vmul.f32 0.5, %v403_v11  ;;  %v3288_v11 = vld [vmem:[#allocation23_spill] sm:$0xff] }
 0x103   :  { %2129 = vtanh.f32 %v402_v5 }
 0x104   :  { %2131 = vtanh.f32 %v413_v4  ;;  %v3293_v4 = vld [vmem:[#allocation16_spill] sm:$0xff] }
 0x10d   :  { %v2126_v6 = vpop.eup %2125 }
 0x10e   :  { %v406_v14 = vmul.f32 0.5, %v2126_v6  ;;  %v3294_v6 = vld [vmem:[#allocation18_spill] sm:$0xff] }
 0x10f   :  { %v2128_v12 = vpop.eup %2127 }
 0x110   :  { %v407_v15 = vadd.f32 0.5, %v406_v14  ;;  %v410_v13 = vmul.f32 0.5, %v2128_v12  ;;  %v2130_v0 = vpop.eup %2129  ;;  %v3289_v12 = vld [vmem:[#allocation20_spill] sm:$0xff]  ;;  %v3291_v14 = vld [vmem:[#allocation17_spill] sm:$0xff] }
 0x111   :  { %v2132_v5 = vpop.eup %2131 }
 0x112   :  { %v411_v1 = vadd.f32 0.5, %v410_v13  ;;  %v417_v3 = vmul.f32 0.0, %v407_v15  ;;  %v415_v9 = vmul.f32 0.5, %v2132_v5  ;;  %v3290_v13 = vld [vmem:[#allocation22_spill] sm:$0xff]  ;;  %v3292_v15 = vld [vmem:[#allocation19_spill] sm:$0xff]  ;;  %v3299_v5 = vld [vmem:[#allocation9_spill] sm:$0xff] }
 0x114   :  { %v418_v7 = vmul.f32 %v2130_v0, %v411_v1  ;;  %v416_v61 = vadd.f32 0.5, %v415_v9  ;;  %v3295_v0 = vld [vmem:[#allocation13_spill] sm:$0xff]  ;;  %v3296_v1 = vld [vmem:[#allocation15_spill] sm:$0xff] }
 0x115   :  { %v3300_v9 = vld [vmem:[#allocation11_spill] sm:$0xff] }
 0x116   :  { %v2691_v2 = vadd.f32 %v418_v7, %v417_v3  ;;  %v3297_v3 = vld [vmem:[#allocation12_spill] sm:$0xff]  ;;  %v3298_v7 = vld [vmem:[#allocation14_spill] sm:$0xff] }
 0x118   :  { %2133 = vtanh.f32 %v2691_v2 }
 0x125   :  { %v2134_v63 = vpop.eup %2133 }
 0x126   :  { %v421_v8 = vmul.f32 %v2134_v63, %v416_v61  ;;  %v3301_v61 = vld [vmem:[#allocation8_spill] sm:$0xff]  ;;  %v3302_v63 = vmov 0.0  }
 0x128   :  { %422 = vst [vmem:[%s3219_s2] sm:$0xff] %v421_v8  ;;  %557 = vmatmul.mubr.f32.vlgmr.msra.gmra.mxu0 %v421_v8  ;;  %628 = vmatmul.mubr.f32.vlgmr.msra.gmra.mxu1 %v421_v8  ;;  %v3303_v8 = vld [vmem:[#allocation10_spill] sm:$0xff] }
 0x129   :  { %728 = vmatpush1.msra.mxu0 %v2526_v60  ;;  %799 = vmatpush1.msra.mxu1 %v2536_v62 }
 0x12a   :  { %729 = vmatprep.subr.mxu0 %v2511_v57  ;;  %800 = vmatprep.subr.mxu1 %v2521_v59 }
 0x12b   :  { %730 = vmatpush1.msra.mxu0 %v2506_v56  ;;  %801 = vmatpush1.msra.mxu1 %v2516_v58 }
 0x12c   :  { %731 = vmatprep.subr.mxu0 %v2491_v53  ;;  %802 = vmatprep.subr.mxu1 %v2501_v55 }
 0x12d   :  { %732 = vmatpush1.msra.mxu0 %v2486_v52  ;;  %803 = vmatpush1.msra.mxu1 %v2496_v54 }
 0x12e   :  { %733 = vmatprep.subr.mxu0 %v2471_v49  ;;  %804 = vmatprep.subr.mxu1 %v2481_v51 }
 0x12f   :  { %734 = vmatpush1.msra.mxu0 %v2466_v48  ;;  %805 = vmatpush1.msra.mxu1 %v2476_v50 }
 0x130   :  { %735 = vmatprep.subr.mxu0 %v2451_v45  ;;  %806 = vmatprep.subr.mxu1 %v2461_v47 }
 0x131   :  { %736 = vmatpush1.msra.mxu0 %v2446_v44  ;;  %807 = vmatpush1.msra.mxu1 %v2456_v46 }
 0x132   :  { %737 = vmatprep.subr.mxu0 %v2431_v41  ;;  %808 = vmatprep.subr.mxu1 %v2441_v43 }
 0x133   :  { %738 = vmatpush1.msra.mxu0 %v2426_v40  ;;  %809 = vmatpush1.msra.mxu1 %v2436_v42 }
 0x134   :  { %739 = vmatprep.subr.mxu0 %v2411_v37  ;;  %810 = vmatprep.subr.mxu1 %v2421_v39 }
 0x135   :  { %740 = vmatpush1.msra.mxu0 %v2406_v36  ;;  %811 = vmatpush1.msra.mxu1 %v2416_v38 }
 0x136   :  { %741 = vmatprep.subr.mxu0 %v2391_v33  ;;  %812 = vmatprep.subr.mxu1 %v2401_v35 }
 0x137   :  { %742 = vmatpush1.msra.mxu0 %v2386_v32  ;;  %813 = vmatpush1.msra.mxu1 %v2396_v34 }
 0x138   :  { %743 = vmatprep.subr.mxu0 %v2371_v29  ;;  %814 = vmatprep.subr.mxu1 %v2381_v31 }
 0x139   :  { %744 = vmatpush1.msra.mxu0 %v2366_v28  ;;  %815 = vmatpush1.msra.mxu1 %v2376_v30 }
 0x13a   :  { %745 = vmatprep.subr.mxu0 %v2351_v25  ;;  %816 = vmatprep.subr.mxu1 %v2361_v27 }
 0x13b   :  { %746 = vmatpush1.msra.mxu0 %v2346_v24  ;;  %817 = vmatpush1.msra.mxu1 %v2356_v26 }
 0x13c   :  { %747 = vmatprep.subr.mxu0 %v3285_v21  ;;  %818 = vmatprep.subr.mxu1 %v2341_v23 }
 0x13d   :  { %748 = vmatpush1.msra.mxu0 %v2326_v20  ;;  %819 = vmatpush1.msra.mxu1 %v2336_v22 }
 0x13e   :  { %749 = vmatprep.subr.mxu0 %v2311_v17  ;;  %820 = vmatprep.subr.mxu1 %v2321_v19 }
 0x13f   :  { %750 = vmatpush1.msra.mxu0 %v2306_v16  ;;  %821 = vmatpush1.msra.mxu1 %v2316_v18 }
 0x140   :  { %751 = vmatprep.subr.mxu0 %v3287_v10  ;;  %822 = vmatprep.subr.mxu1 %v3288_v11 }
 0x141   :  { %752 = vmatpush1.msra.mxu0 %v3289_v12  ;;  %823 = vmatpush1.msra.mxu1 %v3290_v13 }
 0x142   :  { %753 = vmatprep.subr.mxu0 %v3291_v14  ;;  %824 = vmatprep.subr.mxu1 %v3292_v15  ;;  %v2091_v15 = vld [vmem:[%s3217_s0 + $0x38] sm:$0xff] }
 0x143   :  { %754 = vmatpush1.msra.mxu0 %v3293_v4  ;;  %825 = vmatpush1.msra.mxu1 %v3294_v6  ;;  %v3304_v6 = vld [vmem:[#allocation25_spill] sm:$0xff] }
 0x144   :  { %755 = vmatprep.subr.mxu0 %v3295_v0  ;;  %826 = vmatprep.subr.mxu1 %v3296_v1  ;;  %v3305_v0 = vld [vmem:[#allocation26_spill] sm:$0xff] }
 0x145   :  { %756 = vmatpush1.msra.mxu0 %v3297_v3  ;;  %827 = vmatpush1.msra.mxu1 %v3298_v7  ;;  %v2088_v7 = vld [vmem:[%s3217_s0 + $0x20] sm:$0xff] }
 0x146   :  { %757 = vmatprep.subr.mxu0 %v3299_v5  ;;  %828 = vmatprep.subr.mxu1 %v3300_v9  ;;  %v2089_v9 = vld [vmem:[%s3217_s0 + $0x28] sm:$0xff] }
 0x147   :  { %758 = vmatpush1.msra.mxu0 %v3301_v61  ;;  %791 = vmatprep.mubr.f32.mxu0 %v3302_v63 }
 0x148   :  { %829 = vmatpush1.msra.mxu1 %v3303_v8  ;;  %862 = vmatprep.mubr.f32.mxu1 %v3302_v63  ;;  %v2090_v8 = vld [vmem:[%s3217_s0 + $0x30] sm:$0xff] }
 0x149   :  { %962 = vmatprep.subr.mxu0 %v3304_v6  ;;  %1033 = vmatprep.subr.mxu1 %v3305_v0 }
 0x1e8   :  { %v558_v3 = vpop.f32.mrf.mxu0  ;;  %v629_v6 = vpop.f32.mrf.mxu1 }
 0x1e9   :  { %v634_v61 = vadd.f32 %v2088_v7, %v558_v3  ;;  %v636_v63 = vadd.f32 %v2090_v8, %v629_v6 }
 0x1ea   :  { %v560_v5 = vpop.f32.mrf.mxu0  ;;  %v631_v14 = vpop.f32.mrf.mxu1 }
 0x1eb   :  { %v638_v1 = vmul.f32 0.5, %v634_v61  ;;  %v635_v4 = vadd.f32 %v2089_v9, %v560_v5  ;;  %v637_v13 = vadd.f32 %v2091_v15, %v631_v14  ;;  %v3310_v15 = vld [vmem:[#allocation17_spill] sm:$0xff] }
 0x1ed   :  { %2135 = vtanh.f32 %v638_v1  ;;  %v642_v0 = vmul.f32 0.5, %v635_v4  ;;  %v647_v3 = vmul.f32 0.5, %v637_v13 }
 0x1ef   :  { %2137 = vtanh.f32 %v642_v0 }
 0x1f0   :  { %2139 = vtanh.f32 %v636_v63 }
 0x1f1   :  { %2141 = vtanh.f32 %v647_v3  ;;  %v3311_v3 = vld [vmem:[#allocation19_spill] sm:$0xff] }
 0x1fa   :  { %v2136_v7 = vpop.eup %2135 }
 0x1fb   :  { %v640_v61 = vmul.f32 0.5, %v2136_v7  ;;  %v3312_v7 = vld [vmem:[#allocation16_spill] sm:$0xff] }
 0x1fc   :  { %v2138_v5 = vpop.eup %2137 }
 0x1fd   :  { %v641_v9 = vadd.f32 0.5, %v640_v61  ;;  %v644_v12 = vmul.f32 0.5, %v2138_v5  ;;  %v2140_v10 = vpop.eup %2139  ;;  %v3313_v61 = vld [vmem:[#allocation18_spill] sm:$0xff]  ;;  %v3314_v5 = vld [vmem:[#allocation13_spill] sm:$0xff] }
 0x1fe   :  { %v2142_v1 = vpop.eup %2141 }
 0x1ff   :  { %v645_v11 = vadd.f32 0.5, %v644_v12  ;;  %v651_v4 = vmul.f32 %v641_v9, %v2691_v2  ;;  %v649_v8 = vmul.f32 0.5, %v2142_v1  ;;  %v3306_v2 = vld [vmem:[#allocation21_spill] sm:$0xff]  ;;  %v3309_v12 = vld [vmem:[#allocation22_spill] sm:$0xff]  ;;  %v3315_v9 = vld [vmem:[#allocation15_spill] sm:$0xff] }
 0x200   :  { %v3318_v1 = vld [vmem:[#allocation9_spill] sm:$0xff] }
 0x201   :  { %v652_v6 = vmul.f32 %v2140_v10, %v645_v11  ;;  %v650_v63 = vadd.f32 0.5, %v649_v8  ;;  %v3307_v10 = vld [vmem:[#allocation23_spill] sm:$0xff]  ;;  %v3308_v11 = vld [vmem:[#allocation20_spill] sm:$0xff] }
 0x202   :  { %v3319_v8 = vld [vmem:[#allocation11_spill] sm:$0xff] }
 0x203   :  { %v2776_v0 = vadd.f32 %v652_v6, %v651_v4  ;;  %v3316_v4 = vld [vmem:[#allocation12_spill] sm:$0xff]  ;;  %v3317_v6 = vld [vmem:[#allocation14_spill] sm:$0xff] }
 0x205   :  { %2143 = vtanh.f32 %v2776_v0 }
 0x212   :  { %v2144_v14 = vpop.eup %2143 }
 0x213   :  { %v655_v13 = vmul.f32 %v2144_v14, %v650_v63  ;;  %v3320_v63 = vld [vmem:[#allocation8_spill] sm:$0xff]  ;;  %v3321_v14 = vmov 0.0  }
 0x215   :  { %2092 = vst [vmem:[%s3219_s2 + $0x8] sm:$0xff] %v655_v13  ;;  %792 = vmatmul.mubr.f32.vlgmr.msra.gmra.mxu0 %v655_v13  ;;  %863 = vmatmul.mubr.f32.vlgmr.msra.gmra.mxu1 %v655_v13  ;;  %v3322_v13 = vld [vmem:[#allocation10_spill] sm:$0xff] }
 0x216   :  { %963 = vmatpush1.msra.mxu0 %v2526_v60  ;;  %1034 = vmatpush1.msra.mxu1 %v2536_v62 }
 0x217   :  { %964 = vmatprep.subr.mxu0 %v2511_v57  ;;  %1035 = vmatprep.subr.mxu1 %v2521_v59 }
 0x218   :  { %965 = vmatpush1.msra.mxu0 %v2506_v56  ;;  %1036 = vmatpush1.msra.mxu1 %v2516_v58 }
 0x219   :  { %966 = vmatprep.subr.mxu0 %v2491_v53  ;;  %1037 = vmatprep.subr.mxu1 %v2501_v55 }
 0x21a   :  { %967 = vmatpush1.msra.mxu0 %v2486_v52  ;;  %1038 = vmatpush1.msra.mxu1 %v2496_v54 }
 0x21b   :  { %968 = vmatprep.subr.mxu0 %v2471_v49  ;;  %1039 = vmatprep.subr.mxu1 %v2481_v51 }
 0x21c   :  { %969 = vmatpush1.msra.mxu0 %v2466_v48  ;;  %1040 = vmatpush1.msra.mxu1 %v2476_v50 }
 0x21d   :  { %970 = vmatprep.subr.mxu0 %v2451_v45  ;;  %1041 = vmatprep.subr.mxu1 %v2461_v47 }
 0x21e   :  { %971 = vmatpush1.msra.mxu0 %v2446_v44  ;;  %1042 = vmatpush1.msra.mxu1 %v2456_v46 }
 0x21f   :  { %972 = vmatprep.subr.mxu0 %v2431_v41  ;;  %1043 = vmatprep.subr.mxu1 %v2441_v43 }
 0x220   :  { %973 = vmatpush1.msra.mxu0 %v2426_v40  ;;  %1044 = vmatpush1.msra.mxu1 %v2436_v42 }
 0x221   :  { %974 = vmatprep.subr.mxu0 %v2411_v37  ;;  %1045 = vmatprep.subr.mxu1 %v2421_v39 }
 0x222   :  { %975 = vmatpush1.msra.mxu0 %v2406_v36  ;;  %1046 = vmatpush1.msra.mxu1 %v2416_v38 }
 0x223   :  { %976 = vmatprep.subr.mxu0 %v2391_v33  ;;  %1047 = vmatprep.subr.mxu1 %v2401_v35 }
 0x224   :  { %977 = vmatpush1.msra.mxu0 %v2386_v32  ;;  %1048 = vmatpush1.msra.mxu1 %v2396_v34 }
 0x225   :  { %978 = vmatprep.subr.mxu0 %v2371_v29  ;;  %1049 = vmatprep.subr.mxu1 %v2381_v31 }
 0x226   :  { %979 = vmatpush1.msra.mxu0 %v2366_v28  ;;  %1050 = vmatpush1.msra.mxu1 %v2376_v30 }
 0x227   :  { %980 = vmatprep.subr.mxu0 %v2351_v25  ;;  %1051 = vmatprep.subr.mxu1 %v2361_v27 }
 0x228   :  { %981 = vmatpush1.msra.mxu0 %v2346_v24  ;;  %1052 = vmatpush1.msra.mxu1 %v2356_v26 }
 0x229   :  { %982 = vmatprep.subr.mxu0 %v3285_v21  ;;  %1053 = vmatprep.subr.mxu1 %v2341_v23 }
 0x22a   :  { %983 = vmatpush1.msra.mxu0 %v2326_v20  ;;  %1054 = vmatpush1.msra.mxu1 %v2336_v22 }
 0x22b   :  { %984 = vmatprep.subr.mxu0 %v2311_v17  ;;  %1055 = vmatprep.subr.mxu1 %v2321_v19 }
 0x22c   :  { %985 = vmatpush1.msra.mxu0 %v2306_v16  ;;  %1056 = vmatpush1.msra.mxu1 %v2316_v18 }
 0x22d   :  { %986 = vmatprep.subr.mxu0 %v3306_v2  ;;  %1057 = vmatprep.subr.mxu1 %v3307_v10 }
 0x22e   :  { %987 = vmatpush1.msra.mxu0 %v3308_v11  ;;  %1058 = vmatpush1.msra.mxu1 %v3309_v12 }
 0x22f   :  { %988 = vmatprep.subr.mxu0 %v3310_v15  ;;  %1059 = vmatprep.subr.mxu1 %v3311_v3  ;;  %v2096_v3 = vld [vmem:[%s3217_s0 + $0x58] sm:$0xff] }
 0x230   :  { %989 = vmatpush1.msra.mxu0 %v3312_v7  ;;  %1060 = vmatpush1.msra.mxu1 %v3313_v61  ;;  %v3323_v61 = vld [vmem:[#allocation25_spill] sm:$0xff] }
 0x231   :  { %990 = vmatprep.subr.mxu0 %v3314_v5  ;;  %1061 = vmatprep.subr.mxu1 %v3315_v9  ;;  %v3324_v5 = vld [vmem:[#allocation26_spill] sm:$0xff] }
 0x232   :  { %991 = vmatpush1.msra.mxu0 %v3316_v4  ;;  %1062 = vmatpush1.msra.mxu1 %v3317_v6  ;;  %v2093_v6 = vld [vmem:[%s3217_s0 + $0x40] sm:$0xff] }
 0x233   :  { %992 = vmatprep.subr.mxu0 %v3318_v1  ;;  %1063 = vmatprep.subr.mxu1 %v3319_v8  ;;  %v2094_v8 = vld [vmem:[%s3217_s0 + $0x48] sm:$0xff] }
 0x234   :  { %993 = vmatpush1.msra.mxu0 %v3320_v63  ;;  %1026 = vmatprep.mubr.f32.mxu0 %v3321_v14 }
 0x235   :  { %1064 = vmatpush1.msra.mxu1 %v3322_v13  ;;  %1097 = vmatprep.mubr.f32.mxu1 %v3321_v14  ;;  %v2095_v13 = vld [vmem:[%s3217_s0 + $0x50] sm:$0xff] }
 0x236   :  { %1197 = vmatprep.subr.mxu0 %v3323_v61  ;;  %1268 = vmatprep.subr.mxu1 %v3324_v5 }
 0x2d5   :  { %v793_v4 = vpop.f32.mrf.mxu0  ;;  %v864_v61 = vpop.f32.mrf.mxu1 }
 0x2d6   :  { %v869_v63 = vadd.f32 %v2093_v6, %v793_v4  ;;  %v871_v14 = vadd.f32 %v2095_v13, %v864_v61 }
 0x2d7   :  { %v795_v1 = vpop.f32.mrf.mxu0  ;;  %v866_v15 = vpop.f32.mrf.mxu1 }
 0x2d8   :  { %v873_v9 = vmul.f32 0.5, %v869_v63  ;;  %v870_v7 = vadd.f32 %v2094_v8, %v795_v1  ;;  %v872_v12 = vadd.f32 %v2096_v3, %v866_v15  ;;  %v3329_v3 = vld [vmem:[#allocation17_spill] sm:$0xff] }
 0x2da   :  { %2145 = vtanh.f32 %v873_v9  ;;  %v877_v5 = vmul.f32 0.5, %v870_v7  ;;  %v882_v4 = vmul.f32 0.5, %v872_v12 }
 0x2dc   :  { %2147 = vtanh.f32 %v877_v5 }
 0x2dd   :  { %2149 = vtanh.f32 %v871_v14 }
 0x2de   :  { %2151 = vtanh.f32 %v882_v4  ;;  %v3330_v4 = vld [vmem:[#allocation19_spill] sm:$0xff] }
 0x2e7   :  { %v2146_v6 = vpop.eup %2145 }
 0x2e8   :  { %v875_v63 = vmul.f32 0.5, %v2146_v6  ;;  %v3331_v6 = vld [vmem:[#allocation16_spill] sm:$0xff] }
 0x2e9   :  { %v2148_v1 = vpop.eup %2147 }
 0x2ea   :  { %v876_v8 = vadd.f32 0.5, %v875_v63  ;;  %v879_v11 = vmul.f32 0.5, %v2148_v1  ;;  %v2150_v2 = vpop.eup %2149  ;;  %v3332_v63 = vld [vmem:[#allocation18_spill] sm:$0xff]  ;;  %v3333_v1 = vld [vmem:[#allocation13_spill] sm:$0xff] }
 0x2eb   :  { %v2152_v9 = vpop.eup %2151 }
 0x2ec   :  { %v880_v10 = vadd.f32 0.5, %v879_v11  ;;  %v886_v7 = vmul.f32 %v876_v8, %v2776_v0  ;;  %v884_v13 = vmul.f32 0.5, %v2152_v9  ;;  %v3325_v0 = vld [vmem:[#allocation21_spill] sm:$0xff]  ;;  %v3328_v11 = vld [vmem:[#allocation22_spill] sm:$0xff]  ;;  %v3334_v8 = vld [vmem:[#allocation15_spill] sm:$0xff] }
 0x2ed   :  { %v3337_v9 = vld [vmem:[#allocation9_spill] sm:$0xff] }
 0x2ee   :  { %v887_v61 = vmul.f32 %v2150_v2, %v880_v10  ;;  %v885_v14 = vadd.f32 0.5, %v884_v13  ;;  %v3326_v2 = vld [vmem:[#allocation23_spill] sm:$0xff]  ;;  %v3327_v10 = vld [vmem:[#allocation20_spill] sm:$0xff] }
 0x2ef   :  { %v3338_v13 = vld [vmem:[#allocation11_spill] sm:$0xff] }
 0x2f0   :  { %v2861_v5 = vadd.f32 %v887_v61, %v886_v7  ;;  %v3335_v7 = vld [vmem:[#allocation12_spill] sm:$0xff]  ;;  %v3336_v61 = vld [vmem:[#allocation14_spill] sm:$0xff] }
 0x2f2   :  { %2153 = vtanh.f32 %v2861_v5 }
 0x2ff   :  { %v2154_v15 = vpop.eup %2153 }
 0x300   :  { %v890_v12 = vmul.f32 %v2154_v15, %v885_v14  ;;  %v3339_v14 = vld [vmem:[#allocation8_spill] sm:$0xff]  ;;  %v3340_v15 = vmov 0.0  }
 0x302   :  { %2097 = vst [vmem:[%s3219_s2 + $0x10] sm:$0xff] %v890_v12  ;;  %1027 = vmatmul.mubr.f32.vlgmr.msra.gmra.mxu0 %v890_v12  ;;  %1098 = vmatmul.mubr.f32.vlgmr.msra.gmra.mxu1 %v890_v12  ;;  %v3341_v12 = vld [vmem:[#allocation10_spill] sm:$0xff] }
 0x303   :  { %1198 = vmatpush1.msra.mxu0 %v2526_v60  ;;  %1269 = vmatpush1.msra.mxu1 %v2536_v62 }
 0x304   :  { %1199 = vmatprep.subr.mxu0 %v2511_v57  ;;  %1270 = vmatprep.subr.mxu1 %v2521_v59 }
 0x305   :  { %1200 = vmatpush1.msra.mxu0 %v2506_v56  ;;  %1271 = vmatpush1.msra.mxu1 %v2516_v58 }
 0x306   :  { %1201 = vmatprep.subr.mxu0 %v2491_v53  ;;  %1272 = vmatprep.subr.mxu1 %v2501_v55 }
 0x307   :  { %1202 = vmatpush1.msra.mxu0 %v2486_v52  ;;  %1273 = vmatpush1.msra.mxu1 %v2496_v54 }
 0x308   :  { %1203 = vmatprep.subr.mxu0 %v2471_v49  ;;  %1274 = vmatprep.subr.mxu1 %v2481_v51 }
 0x309   :  { %1204 = vmatpush1.msra.mxu0 %v2466_v48  ;;  %1275 = vmatpush1.msra.mxu1 %v2476_v50 }
 0x30a   :  { %1205 = vmatprep.subr.mxu0 %v2451_v45  ;;  %1276 = vmatprep.subr.mxu1 %v2461_v47 }
 0x30b   :  { %1206 = vmatpush1.msra.mxu0 %v2446_v44  ;;  %1277 = vmatpush1.msra.mxu1 %v2456_v46 }
 0x30c   :  { %1207 = vmatprep.subr.mxu0 %v2431_v41  ;;  %1278 = vmatprep.subr.mxu1 %v2441_v43 }
 0x30d   :  { %1208 = vmatpush1.msra.mxu0 %v2426_v40  ;;  %1279 = vmatpush1.msra.mxu1 %v2436_v42 }
 0x30e   :  { %1209 = vmatprep.subr.mxu0 %v2411_v37  ;;  %1280 = vmatprep.subr.mxu1 %v2421_v39 }
 0x30f   :  { %1210 = vmatpush1.msra.mxu0 %v2406_v36  ;;  %1281 = vmatpush1.msra.mxu1 %v2416_v38 }
 0x310   :  { %1211 = vmatprep.subr.mxu0 %v2391_v33  ;;  %1282 = vmatprep.subr.mxu1 %v2401_v35 }
 0x311   :  { %1212 = vmatpush1.msra.mxu0 %v2386_v32  ;;  %1283 = vmatpush1.msra.mxu1 %v2396_v34 }
 0x312   :  { %1213 = vmatprep.subr.mxu0 %v2371_v29  ;;  %1284 = vmatprep.subr.mxu1 %v2381_v31 }
 0x313   :  { %1214 = vmatpush1.msra.mxu0 %v2366_v28  ;;  %1285 = vmatpush1.msra.mxu1 %v2376_v30 }
 0x314   :  { %1215 = vmatprep.subr.mxu0 %v2351_v25  ;;  %1286 = vmatprep.subr.mxu1 %v2361_v27 }
 0x315   :  { %1216 = vmatpush1.msra.mxu0 %v2346_v24  ;;  %1287 = vmatpush1.msra.mxu1 %v2356_v26 }
 0x316   :  { %1217 = vmatprep.subr.mxu0 %v3285_v21  ;;  %1288 = vmatprep.subr.mxu1 %v2341_v23 }
 0x317   :  { %1218 = vmatpush1.msra.mxu0 %v2326_v20  ;;  %1289 = vmatpush1.msra.mxu1 %v2336_v22 }
 0x318   :  { %1219 = vmatprep.subr.mxu0 %v2311_v17  ;;  %1290 = vmatprep.subr.mxu1 %v2321_v19 }
 0x319   :  { %1220 = vmatpush1.msra.mxu0 %v2306_v16  ;;  %1291 = vmatpush1.msra.mxu1 %v2316_v18 }
 0x31a   :  { %1221 = vmatprep.subr.mxu0 %v3325_v0  ;;  %1292 = vmatprep.subr.mxu1 %v3326_v2 }
 0x31b   :  { %1222 = vmatpush1.msra.mxu0 %v3327_v10  ;;  %1293 = vmatpush1.msra.mxu1 %v3328_v11 }
 0x31c   :  { %1223 = vmatprep.subr.mxu0 %v3329_v3  ;;  %1294 = vmatprep.subr.mxu1 %v3330_v4  ;;  %v2101_v4 = vld [vmem:[%s3217_s0 + $0x78] sm:$0xff] }
 0x31d   :  { %1224 = vmatpush1.msra.mxu0 %v3331_v6  ;;  %1295 = vmatpush1.msra.mxu1 %v3332_v63  ;;  %v3342_v63 = vld [vmem:[#allocation25_spill] sm:$0xff] }
 0x31e   :  { %1225 = vmatprep.subr.mxu0 %v3333_v1  ;;  %1296 = vmatprep.subr.mxu1 %v3334_v8  ;;  %v3343_v1 = vld [vmem:[#allocation26_spill] sm:$0xff] }
 0x31f   :  { %1226 = vmatpush1.msra.mxu0 %v3335_v7  ;;  %1297 = vmatpush1.msra.mxu1 %v3336_v61  ;;  %v2098_v61 = vld [vmem:[%s3217_s0 + $0x60] sm:$0xff] }
 0x320   :  { %1227 = vmatprep.subr.mxu0 %v3337_v9  ;;  %1298 = vmatprep.subr.mxu1 %v3338_v13  ;;  %v2099_v13 = vld [vmem:[%s3217_s0 + $0x68] sm:$0xff] }
 0x321   :  { %1228 = vmatpush1.msra.mxu0 %v3339_v14  ;;  %1261 = vmatprep.mubr.f32.mxu0 %v3340_v15 }
 0x322   :  { %1299 = vmatpush1.msra.mxu1 %v3341_v12  ;;  %1332 = vmatprep.mubr.f32.mxu1 %v3340_v15  ;;  %v2100_v12 = vld [vmem:[%s3217_s0 + $0x70] sm:$0xff] }
 0x323   :  { %1432 = vmatprep.subr.mxu0 %v3342_v63  ;;  %1503 = vmatprep.subr.mxu1 %v3343_v1 }
 0x3c2   :  { %v1028_v7 = vpop.f32.mrf.mxu0  ;;  %v1099_v63 = vpop.f32.mrf.mxu1 }
 0x3c3   :  { %v1104_v14 = vadd.f32 %v2098_v61, %v1028_v7  ;;  %v1106_v15 = vadd.f32 %v2100_v12, %v1099_v63 }
 0x3c4   :  { %v1030_v9 = vpop.f32.mrf.mxu0  ;;  %v1101_v3 = vpop.f32.mrf.mxu1 }
 0x3c5   :  { %v1108_v8 = vmul.f32 0.5, %v1104_v14  ;;  %v1105_v6 = vadd.f32 %v2099_v13, %v1030_v9  ;;  %v1107_v11 = vadd.f32 %v2101_v4, %v1101_v3  ;;  %v3348_v4 = vld [vmem:[#allocation17_spill] sm:$0xff] }
 0x3c7   :  { %2155 = vtanh.f32 %v1108_v8  ;;  %v1112_v1 = vmul.f32 0.5, %v1105_v6  ;;  %v1117_v7 = vmul.f32 0.5, %v1107_v11 }
 0x3c9   :  { %2157 = vtanh.f32 %v1112_v1 }
 0x3ca   :  { %2159 = vtanh.f32 %v1106_v15 }
 0x3cb   :  { %2161 = vtanh.f32 %v1117_v7  ;;  %v3349_v7 = vld [vmem:[#allocation19_spill] sm:$0xff] }
 0x3d4   :  { %v2156_v61 = vpop.eup %2155 }
 0x3d5   :  { %v1110_v14 = vmul.f32 0.5, %v2156_v61  ;;  %v3350_v61 = vld [vmem:[#allocation16_spill] sm:$0xff] }
 0x3d6   :  { %v2158_v9 = vpop.eup %2157 }
 0x3d7   :  { %v1111_v13 = vadd.f32 0.5, %v1110_v14  ;;  %v1114_v10 = vmul.f32 0.5, %v2158_v9  ;;  %v2160_v0 = vpop.eup %2159  ;;  %v3351_v14 = vld [vmem:[#allocation18_spill] sm:$0xff]  ;;  %v3352_v9 = vld [vmem:[#allocation13_spill] sm:$0xff] }
 0x3d8   :  { %v2162_v8 = vpop.eup %2161 }
 0x3d9   :  { %v1115_v2 = vadd.f32 0.5, %v1114_v10  ;;  %v1121_v6 = vmul.f32 %v1111_v13, %v2861_v5  ;;  %v1119_v12 = vmul.f32 0.5, %v2162_v8  ;;  %v3344_v5 = vld [vmem:[#allocation21_spill] sm:$0xff]  ;;  %v3347_v10 = vld [vmem:[#allocation22_spill] sm:$0xff]  ;;  %v3353_v13 = vld [vmem:[#allocation15_spill] sm:$0xff] }
 0x3da   :  { %v3356_v8 = vld [vmem:[#allocation9_spill] sm:$0xff] }
 0x3db   :  { %v1122_v63 = vmul.f32 %v2160_v0, %v1115_v2  ;;  %v1120_v15 = vadd.f32 0.5, %v1119_v12  ;;  %v3345_v0 = vld [vmem:[#allocation23_spill] sm:$0xff]  ;;  %v3346_v2 = vld [vmem:[#allocation20_spill] sm:$0xff] }
 0x3dc   :  { %v3357_v12 = vld [vmem:[#allocation11_spill] sm:$0xff] }
 0x3dd   :  { %v2946_v1 = vadd.f32 %v1122_v63, %v1121_v6  ;;  %v3354_v6 = vld [vmem:[#allocation12_spill] sm:$0xff]  ;;  %v3355_v63 = vld [vmem:[#allocation14_spill] sm:$0xff] }
 0x3df   :  { %2163 = vtanh.f32 %v2946_v1 }
 0x3ec   :  { %v2164_v3 = vpop.eup %2163 }
 0x3ed   :  { %v1125_v11 = vmul.f32 %v2164_v3, %v1120_v15  ;;  %v3358_v15 = vld [vmem:[#allocation8_spill] sm:$0xff]  ;;  %v3359_v3 = vmov 0.0  }
 0x3ef   :  { %2102 = vst [vmem:[%s3219_s2 + $0x18] sm:$0xff] %v1125_v11  ;;  %1262 = vmatmul.mubr.f32.vlgmr.msra.gmra.mxu0 %v1125_v11  ;;  %1333 = vmatmul.mubr.f32.vlgmr.msra.gmra.mxu1 %v1125_v11  ;;  %v3360_v11 = vld [vmem:[#allocation10_spill] sm:$0xff] }
 0x3f0   :  { %1433 = vmatpush1.msra.mxu0 %v2526_v60  ;;  %1504 = vmatpush1.msra.mxu1 %v2536_v62 }
 0x3f1   :  { %1434 = vmatprep.subr.mxu0 %v2511_v57  ;;  %1505 = vmatprep.subr.mxu1 %v2521_v59 }
 0x3f2   :  { %1435 = vmatpush1.msra.mxu0 %v2506_v56  ;;  %1506 = vmatpush1.msra.mxu1 %v2516_v58 }
 0x3f3   :  { %1436 = vmatprep.subr.mxu0 %v2491_v53  ;;  %1507 = vmatprep.subr.mxu1 %v2501_v55 }
 0x3f4   :  { %1437 = vmatpush1.msra.mxu0 %v2486_v52  ;;  %1508 = vmatpush1.msra.mxu1 %v2496_v54 }
 0x3f5   :  { %1438 = vmatprep.subr.mxu0 %v2471_v49  ;;  %1509 = vmatprep.subr.mxu1 %v2481_v51 }
 0x3f6   :  { %1439 = vmatpush1.msra.mxu0 %v2466_v48  ;;  %1510 = vmatpush1.msra.mxu1 %v2476_v50 }
 0x3f7   :  { %1440 = vmatprep.subr.mxu0 %v2451_v45  ;;  %1511 = vmatprep.subr.mxu1 %v2461_v47 }
 0x3f8   :  { %1441 = vmatpush1.msra.mxu0 %v2446_v44  ;;  %1512 = vmatpush1.msra.mxu1 %v2456_v46 }
 0x3f9   :  { %1442 = vmatprep.subr.mxu0 %v2431_v41  ;;  %1513 = vmatprep.subr.mxu1 %v2441_v43 }
 0x3fa   :  { %1443 = vmatpush1.msra.mxu0 %v2426_v40  ;;  %1514 = vmatpush1.msra.mxu1 %v2436_v42 }
 0x3fb   :  { %1444 = vmatprep.subr.mxu0 %v2411_v37  ;;  %1515 = vmatprep.subr.mxu1 %v2421_v39 }
 0x3fc   :  { %1445 = vmatpush1.msra.mxu0 %v2406_v36  ;;  %1516 = vmatpush1.msra.mxu1 %v2416_v38 }
 0x3fd   :  { %1446 = vmatprep.subr.mxu0 %v2391_v33  ;;  %1517 = vmatprep.subr.mxu1 %v2401_v35 }
 0x3fe   :  { %1447 = vmatpush1.msra.mxu0 %v2386_v32  ;;  %1518 = vmatpush1.msra.mxu1 %v2396_v34 }
 0x3ff   :  { %1448 = vmatprep.subr.mxu0 %v2371_v29  ;;  %1519 = vmatprep.subr.mxu1 %v2381_v31 }
 0x400   :  { %1449 = vmatpush1.msra.mxu0 %v2366_v28  ;;  %1520 = vmatpush1.msra.mxu1 %v2376_v30 }
 0x401   :  { %1450 = vmatprep.subr.mxu0 %v2351_v25  ;;  %1521 = vmatprep.subr.mxu1 %v2361_v27 }
 0x402   :  { %1451 = vmatpush1.msra.mxu0 %v2346_v24  ;;  %1522 = vmatpush1.msra.mxu1 %v2356_v26 }
 0x403   :  { %1452 = vmatprep.subr.mxu0 %v3285_v21  ;;  %1523 = vmatprep.subr.mxu1 %v2341_v23 }
 0x404   :  { %1453 = vmatpush1.msra.mxu0 %v2326_v20  ;;  %1524 = vmatpush1.msra.mxu1 %v2336_v22 }
 0x405   :  { %1454 = vmatprep.subr.mxu0 %v2311_v17  ;;  %1525 = vmatprep.subr.mxu1 %v2321_v19 }
 0x406   :  { %1455 = vmatpush1.msra.mxu0 %v2306_v16  ;;  %1526 = vmatpush1.msra.mxu1 %v2316_v18 }
 0x407   :  { %1456 = vmatprep.subr.mxu0 %v3344_v5  ;;  %1527 = vmatprep.subr.mxu1 %v3345_v0 }
 0x408   :  { %1457 = vmatpush1.msra.mxu0 %v3346_v2  ;;  %1528 = vmatpush1.msra.mxu1 %v3347_v10 }
 0x409   :  { %1458 = vmatprep.subr.mxu0 %v3348_v4  ;;  %1529 = vmatprep.subr.mxu1 %v3349_v7  ;;  %v2106_v7 = vld [vmem:[%s3217_s0 + $0x98] sm:$0xff] }
 0x40a   :  { %1459 = vmatpush1.msra.mxu0 %v3350_v61  ;;  %1530 = vmatpush1.msra.mxu1 %v3351_v14  ;;  %v3361_v14 = vld [vmem:[#allocation25_spill] sm:$0xff] }
 0x40b   :  { %1460 = vmatprep.subr.mxu0 %v3352_v9  ;;  %1531 = vmatprep.subr.mxu1 %v3353_v13  ;;  %v3362_v9 = vld [vmem:[#allocation26_spill] sm:$0xff] }
 0x40c   :  { %1461 = vmatpush1.msra.mxu0 %v3354_v6  ;;  %1532 = vmatpush1.msra.mxu1 %v3355_v63  ;;  %v2103_v63 = vld [vmem:[%s3217_s0 + $0x80] sm:$0xff] }
 0x40d   :  { %1462 = vmatprep.subr.mxu0 %v3356_v8  ;;  %1533 = vmatprep.subr.mxu1 %v3357_v12  ;;  %v2104_v12 = vld [vmem:[%s3217_s0 + $0x88] sm:$0xff] }
 0x40e   :  { %1463 = vmatpush1.msra.mxu0 %v3358_v15  ;;  %1496 = vmatprep.mubr.f32.mxu0 %v3359_v3 }
 0x40f   :  { %1534 = vmatpush1.msra.mxu1 %v3360_v11  ;;  %1567 = vmatprep.mubr.f32.mxu1 %v3359_v3  ;;  %v2105_v11 = vld [vmem:[%s3217_s0 + $0x90] sm:$0xff] }
 0x410   :  { %1667 = vmatprep.subr.mxu0 %v3361_v14  ;;  %1738 = vmatprep.subr.mxu1 %v3362_v9 }
 0x4af   :  { %v1263_v6 = vpop.f32.mrf.mxu0  ;;  %v1334_v14 = vpop.f32.mrf.mxu1 }
 0x4b0   :  { %v1339_v15 = vadd.f32 %v2103_v63, %v1263_v6  ;;  %v1341_v3 = vadd.f32 %v2105_v11, %v1334_v14 }
 0x4b1   :  { %v1265_v8 = vpop.f32.mrf.mxu0  ;;  %v1336_v4 = vpop.f32.mrf.mxu1 }
 0x4b2   :  { %v1343_v13 = vmul.f32 0.5, %v1339_v15  ;;  %v1340_v61 = vadd.f32 %v2104_v12, %v1265_v8  ;;  %v1342_v10 = vadd.f32 %v2106_v7, %v1336_v4  ;;  %v3367_v7 = vld [vmem:[#allocation17_spill] sm:$0xff] }
 0x4b4   :  { %2165 = vtanh.f32 %v1343_v13  ;;  %v1347_v9 = vmul.f32 0.5, %v1340_v61  ;;  %v1352_v6 = vmul.f32 0.5, %v1342_v10 }
 0x4b6   :  { %2167 = vtanh.f32 %v1347_v9 }
 0x4b7   :  { %2169 = vtanh.f32 %v1341_v3 }
 0x4b8   :  { %2171 = vtanh.f32 %v1352_v6  ;;  %v3368_v6 = vld [vmem:[#allocation19_spill] sm:$0xff] }
 0x4c1   :  { %v2166_v63 = vpop.eup %2165 }
 0x4c2   :  { %v1345_v15 = vmul.f32 0.5, %v2166_v63  ;;  %v3369_v63 = vld [vmem:[#allocation16_spill] sm:$0xff] }
 0x4c3   :  { %v2168_v8 = vpop.eup %2167 }
 0x4c4   :  { %v1346_v12 = vadd.f32 0.5, %v1345_v15  ;;  %v1349_v2 = vmul.f32 0.5, %v2168_v8  ;;  %v2170_v5 = vpop.eup %2169  ;;  %v3370_v15 = vld [vmem:[#allocation18_spill] sm:$0xff]  ;;  %v3371_v8 = vld [vmem:[#allocation13_spill] sm:$0xff] }
 0x4c5   :  { %v2172_v13 = vpop.eup %2171 }
 0x4c6   :  { %v1350_v0 = vadd.f32 0.5, %v1349_v2  ;;  %v1356_v61 = vmul.f32 %v1346_v12, %v2946_v1  ;;  %v1354_v11 = vmul.f32 0.5, %v2172_v13  ;;  %v3363_v1 = vld [vmem:[#allocation21_spill] sm:$0xff]  ;;  %v3366_v2 = vld [vmem:[#allocation22_spill] sm:$0xff]  ;;  %v3372_v12 = vld [vmem:[#allocation15_spill] sm:$0xff] }
 0x4c7   :  { %v3375_v13 = vld [vmem:[#allocation9_spill] sm:$0xff] }
 0x4c8   :  { %v1357_v14 = vmul.f32 %v2170_v5, %v1350_v0  ;;  %v1355_v3 = vadd.f32 0.5, %v1354_v11  ;;  %v3364_v5 = vld [vmem:[#allocation23_spill] sm:$0xff]  ;;  %v3365_v0 = vld [vmem:[#allocation20_spill] sm:$0xff] }
 0x4c9   :  { %v3376_v11 = vld [vmem:[#allocation11_spill] sm:$0xff] }
 0x4ca   :  { %v3031_v9 = vadd.f32 %v1357_v14, %v1356_v61  ;;  %v3373_v61 = vld [vmem:[#allocation12_spill] sm:$0xff]  ;;  %v3374_v14 = vld [vmem:[#allocation14_spill] sm:$0xff] }
 0x4cc   :  { %2173 = vtanh.f32 %v3031_v9 }
 0x4d9   :  { %v2174_v4 = vpop.eup %2173 }
 0x4da   :  { %v1360_v10 = vmul.f32 %v2174_v4, %v1355_v3  ;;  %v3377_v3 = vld [vmem:[#allocation8_spill] sm:$0xff]  ;;  %v3378_v4 = vmov 0.0  }
 0x4dc   :  { %2107 = vst [vmem:[%s3219_s2 + $0x20] sm:$0xff] %v1360_v10  ;;  %1497 = vmatmul.mubr.f32.vlgmr.msra.gmra.mxu0 %v1360_v10  ;;  %1568 = vmatmul.mubr.f32.vlgmr.msra.gmra.mxu1 %v1360_v10  ;;  %v3379_v10 = vld [vmem:[#allocation10_spill] sm:$0xff] }
 0x4dd   :  { %1668 = vmatpush1.msra.mxu0 %v2526_v60  ;;  %1739 = vmatpush1.msra.mxu1 %v2536_v62 }
 0x4de   :  { %1669 = vmatprep.subr.mxu0 %v2511_v57  ;;  %1740 = vmatprep.subr.mxu1 %v2521_v59 }
 0x4df   :  { %1670 = vmatpush1.msra.mxu0 %v2506_v56  ;;  %1741 = vmatpush1.msra.mxu1 %v2516_v58 }
 0x4e0   :  { %1671 = vmatprep.subr.mxu0 %v2491_v53  ;;  %1742 = vmatprep.subr.mxu1 %v2501_v55 }
 0x4e1   :  { %1672 = vmatpush1.msra.mxu0 %v2486_v52  ;;  %1743 = vmatpush1.msra.mxu1 %v2496_v54 }
 0x4e2   :  { %1673 = vmatprep.subr.mxu0 %v2471_v49  ;;  %1744 = vmatprep.subr.mxu1 %v2481_v51 }
 0x4e3   :  { %1674 = vmatpush1.msra.mxu0 %v2466_v48  ;;  %1745 = vmatpush1.msra.mxu1 %v2476_v50 }
 0x4e4   :  { %1675 = vmatprep.subr.mxu0 %v2451_v45  ;;  %1746 = vmatprep.subr.mxu1 %v2461_v47 }
 0x4e5   :  { %1676 = vmatpush1.msra.mxu0 %v2446_v44  ;;  %1747 = vmatpush1.msra.mxu1 %v2456_v46 }
 0x4e6   :  { %1677 = vmatprep.subr.mxu0 %v2431_v41  ;;  %1748 = vmatprep.subr.mxu1 %v2441_v43 }
 0x4e7   :  { %1678 = vmatpush1.msra.mxu0 %v2426_v40  ;;  %1749 = vmatpush1.msra.mxu1 %v2436_v42 }
 0x4e8   :  { %1679 = vmatprep.subr.mxu0 %v2411_v37  ;;  %1750 = vmatprep.subr.mxu1 %v2421_v39 }
 0x4e9   :  { %1680 = vmatpush1.msra.mxu0 %v2406_v36  ;;  %1751 = vmatpush1.msra.mxu1 %v2416_v38 }
 0x4ea   :  { %1681 = vmatprep.subr.mxu0 %v2391_v33  ;;  %1752 = vmatprep.subr.mxu1 %v2401_v35 }
 0x4eb   :  { %1682 = vmatpush1.msra.mxu0 %v2386_v32  ;;  %1753 = vmatpush1.msra.mxu1 %v2396_v34 }
 0x4ec   :  { %1683 = vmatprep.subr.mxu0 %v2371_v29  ;;  %1754 = vmatprep.subr.mxu1 %v2381_v31 }
 0x4ed   :  { %1684 = vmatpush1.msra.mxu0 %v2366_v28  ;;  %1755 = vmatpush1.msra.mxu1 %v2376_v30 }
 0x4ee   :  { %1685 = vmatprep.subr.mxu0 %v2351_v25  ;;  %1756 = vmatprep.subr.mxu1 %v2361_v27 }
 0x4ef   :  { %1686 = vmatpush1.msra.mxu0 %v2346_v24  ;;  %1757 = vmatpush1.msra.mxu1 %v2356_v26 }
 0x4f0   :  { %1687 = vmatprep.subr.mxu0 %v3285_v21  ;;  %1758 = vmatprep.subr.mxu1 %v2341_v23 }
 0x4f1   :  { %1688 = vmatpush1.msra.mxu0 %v2326_v20  ;;  %1759 = vmatpush1.msra.mxu1 %v2336_v22 }
 0x4f2   :  { %1689 = vmatprep.subr.mxu0 %v2311_v17  ;;  %1760 = vmatprep.subr.mxu1 %v2321_v19 }
 0x4f3   :  { %1690 = vmatpush1.msra.mxu0 %v2306_v16  ;;  %1761 = vmatpush1.msra.mxu1 %v2316_v18 }
 0x4f4   :  { %1691 = vmatprep.subr.mxu0 %v3363_v1  ;;  %1762 = vmatprep.subr.mxu1 %v3364_v5 }
 0x4f5   :  { %1692 = vmatpush1.msra.mxu0 %v3365_v0  ;;  %1763 = vmatpush1.msra.mxu1 %v3366_v2 }
 0x4f6   :  { %1693 = vmatprep.subr.mxu0 %v3367_v7  ;;  %1764 = vmatprep.subr.mxu1 %v3368_v6  ;;  %v2111_v6 = vld [vmem:[%s3217_s0 + $0xb8] sm:$0xff] }
 0x4f7   :  { %1694 = vmatpush1.msra.mxu0 %v3369_v63  ;;  %1765 = vmatpush1.msra.mxu1 %v3370_v15  ;;  %v3380_v15 = vld [vmem:[#allocation25_spill] sm:$0xff] }
 0x4f8   :  { %1695 = vmatprep.subr.mxu0 %v3371_v8  ;;  %1766 = vmatprep.subr.mxu1 %v3372_v12  ;;  %v3381_v8 = vld [vmem:[#allocation26_spill] sm:$0xff] }
 0x4f9   :  { %1696 = vmatpush1.msra.mxu0 %v3373_v61  ;;  %1767 = vmatpush1.msra.mxu1 %v3374_v14  ;;  %v2108_v14 = vld [vmem:[%s3217_s0 + $0xa0] sm:$0xff] }
 0x4fa   :  { %1697 = vmatprep.subr.mxu0 %v3375_v13  ;;  %1768 = vmatprep.subr.mxu1 %v3376_v11  ;;  %v2109_v11 = vld [vmem:[%s3217_s0 + $0xa8] sm:$0xff] }
 0x4fb   :  { %1698 = vmatpush1.msra.mxu0 %v3377_v3  ;;  %1731 = vmatprep.mubr.f32.mxu0 %v3378_v4 }
 0x4fc   :  { %1769 = vmatpush1.msra.mxu1 %v3379_v10  ;;  %1802 = vmatprep.mubr.f32.mxu1 %v3378_v4  ;;  %v2110_v10 = vld [vmem:[%s3217_s0 + $0xb0] sm:$0xff] }
 0x4fd   :  { %1902 = vmatprep.subr.mxu0 %v3380_v15  ;;  %1973 = vmatprep.subr.mxu1 %v3381_v8 }
 0x59c   :  { %v1498_v61 = vpop.f32.mrf.mxu0  ;;  %v1569_v15 = vpop.f32.mrf.mxu1 }
 0x59d   :  { %v1574_v3 = vadd.f32 %v2108_v14, %v1498_v61  ;;  %v1576_v4 = vadd.f32 %v2110_v10, %v1569_v15 }
 0x59e   :  { %v1500_v13 = vpop.f32.mrf.mxu0  ;;  %v1571_v7 = vpop.f32.mrf.mxu1 }
 0x59f   :  { %v1578_v12 = vmul.f32 0.5, %v1574_v3  ;;  %v1575_v63 = vadd.f32 %v2109_v11, %v1500_v13  ;;  %v1577_v2 = vadd.f32 %v2111_v6, %v1571_v7 }
 0x5a1   :  { %2175 = vtanh.f32 %v1578_v12  ;;  %v1582_v8 = vmul.f32 0.5, %v1575_v63  ;;  %v1587_v61 = vmul.f32 0.5, %v1577_v2 }
 0x5a3   :  { %2177 = vtanh.f32 %v1582_v8 }
 0x5a4   :  { %2179 = vtanh.f32 %v1576_v4 }
 0x5a5   :  { %2181 = vtanh.f32 %v1587_v61 }
 0x5ae   :  { %v2176_v14 = vpop.eup %2175 }
 0x5af   :  { %v1580_v3 = vmul.f32 0.5, %v2176_v14 }
 0x5b0   :  { %v2178_v13 = vpop.eup %2177 }
 0x5b1   :  { %v1581_v11 = vadd.f32 0.5, %v1580_v3  ;;  %v1584_v0 = vmul.f32 0.5, %v2178_v13  ;;  %v2180_v1 = vpop.eup %2179  ;;  %v2120_v13 = vld [vmem:[%s3217_s0 + $0xf0] sm:$0xff] }
 0x5b2   :  { %v2182_v15 = vpop.eup %2181 }
 0x5b3   :  { %v1585_v5 = vadd.f32 0.5, %v1584_v0  ;;  %v1591_v63 = vmul.f32 %v1581_v11, %v3031_v9  ;;  %v1589_v8 = vmul.f32 0.5, %v2182_v15  ;;  %v2119_v0 = vld [vmem:[%s3217_s0 + $0xe8] sm:$0xff] }
 0x5b5   :  { %v1592_v12 = vmul.f32 %v2180_v1, %v1585_v5  ;;  %v1590_v4 = vadd.f32 0.5, %v1589_v8  ;;  %v2118_v1 = vld [vmem:[%s3217_s0 + $0xe0] sm:$0xff] }
 0x5b7   :  { %v3116_v10 = vadd.f32 %v1592_v12, %v1591_v63 }
 0x5b9   :  { %2183 = vtanh.f32 %v3116_v10 }
 0x5c6   :  { %v2184_v7 = vpop.eup %2183 }
 0x5c7   :  { %v1595_v2 = vmul.f32 %v2184_v7, %v1590_v4 }
 0x5c9   :  { %2112 = vst [vmem:[%s3219_s2 + $0x28] sm:$0xff] %v1595_v2  ;;  %1732 = vmatmul.mubr.f32.vlgmr.msra.gmra.mxu0 %v1595_v2  ;;  %1803 = vmatmul.mubr.f32.vlgmr.msra.gmra.mxu1 %v1595_v2 }
 0x5ca   :  { %1903 = vmatpush1.msra.mxu0 %v2526_v60  ;;  %1974 = vmatpush1.msra.mxu1 %v2536_v62 }
 0x5cb   :  { %1904 = vmatprep.subr.mxu0 %v2511_v57  ;;  %1975 = vmatprep.subr.mxu1 %v2521_v59 }
 0x5cc   :  { %1905 = vmatpush1.msra.mxu0 %v2506_v56  ;;  %1976 = vmatpush1.msra.mxu1 %v2516_v58 }
 0x5cd   :  { %1906 = vmatprep.subr.mxu0 %v2491_v53  ;;  %1977 = vmatprep.subr.mxu1 %v2501_v55 }
 0x5ce   :  { %1907 = vmatpush1.msra.mxu0 %v2486_v52  ;;  %1978 = vmatpush1.msra.mxu1 %v2496_v54 }
 0x5cf   :  { %1908 = vmatprep.subr.mxu0 %v2471_v49  ;;  %1979 = vmatprep.subr.mxu1 %v2481_v51 }
 0x5d0   :  { %1909 = vmatpush1.msra.mxu0 %v2466_v48  ;;  %1980 = vmatpush1.msra.mxu1 %v2476_v50 }
 0x5d1   :  { %1910 = vmatprep.subr.mxu0 %v2451_v45  ;;  %1981 = vmatprep.subr.mxu1 %v2461_v47 }
 0x5d2   :  { %1911 = vmatpush1.msra.mxu0 %v2446_v44  ;;  %1982 = vmatpush1.msra.mxu1 %v2456_v46  ;;  %v2116_v44 = vld [vmem:[%s3217_s0 + $0xd8] sm:$0xff] }
 0x5d3   :  { %1912 = vmatprep.subr.mxu0 %v2431_v41  ;;  %1983 = vmatprep.subr.mxu1 %v2441_v43 }
 0x5d4   :  { %1913 = vmatpush1.msra.mxu0 %v2426_v40  ;;  %1984 = vmatpush1.msra.mxu1 %v2436_v42  ;;  %v2115_v40 = vld [vmem:[%s3217_s0 + $0xd0] sm:$0xff] }
 0x5d5   :  { %1914 = vmatprep.subr.mxu0 %v2411_v37  ;;  %1985 = vmatprep.subr.mxu1 %v2421_v39 }
 0x5d6   :  { %1915 = vmatpush1.msra.mxu0 %v2406_v36  ;;  %1986 = vmatpush1.msra.mxu1 %v2416_v38 }
 0x5d7   :  { %1916 = vmatprep.subr.mxu0 %v2391_v33  ;;  %1987 = vmatprep.subr.mxu1 %v2401_v35  ;;  %v2113_v33 = vld [vmem:[%s3217_s0 + $0xc0] sm:$0xff]  ;;  %v2114_v35 = vld [vmem:[%s3217_s0 + $0xc8] sm:$0xff] }
 0x5d8   :  { %1917 = vmatpush1.msra.mxu0 %v2386_v32  ;;  %1988 = vmatpush1.msra.mxu1 %v2396_v34  ;;  %v3398_v32 = vld [vmem:[#allocation10_spill] sm:$0xff] }
 0x5d9   :  { %1918 = vmatprep.subr.mxu0 %v2371_v29  ;;  %1989 = vmatprep.subr.mxu1 %v2381_v31  ;;  %v3395_v29 = vld [vmem:[#allocation11_spill] sm:$0xff]  ;;  %v3397_v31 = vmov 0.0  }
 0x5da   :  { %1919 = vmatpush1.msra.mxu0 %v2366_v28  ;;  %1990 = vmatpush1.msra.mxu1 %v2376_v30  ;;  %v3394_v28 = vld [vmem:[#allocation9_spill] sm:$0xff]  ;;  %v3396_v30 = vld [vmem:[#allocation8_spill] sm:$0xff] }
 0x5db   :  { %1920 = vmatprep.subr.mxu0 %v2351_v25  ;;  %1991 = vmatprep.subr.mxu1 %v2361_v27  ;;  %v3382_v25 = vld [vmem:[#allocation21_spill] sm:$0xff]  ;;  %v3393_v27 = vld [vmem:[#allocation14_spill] sm:$0xff] }
 0x5dc   :  { %1921 = vmatpush1.msra.mxu0 %v2346_v24  ;;  %1992 = vmatpush1.msra.mxu1 %v2356_v26  ;;  %v3383_v24 = vld [vmem:[#allocation23_spill] sm:$0xff]  ;;  %v3384_v26 = vld [vmem:[#allocation20_spill] sm:$0xff] }
 0x5dd   :  { %1922 = vmatprep.subr.mxu0 %v3285_v21  ;;  %1993 = vmatprep.subr.mxu1 %v2341_v23  ;;  %v3385_v21 = vld [vmem:[#allocation22_spill] sm:$0xff]  ;;  %v3386_v23 = vld [vmem:[#allocation17_spill] sm:$0xff] }
 0x5de   :  { %1923 = vmatpush1.msra.mxu0 %v2326_v20  ;;  %1994 = vmatpush1.msra.mxu1 %v2336_v22  ;;  %v3387_v20 = vld [vmem:[#allocation19_spill] sm:$0xff]  ;;  %v3388_v22 = vld [vmem:[#allocation16_spill] sm:$0xff] }
 0x5df   :  { %1924 = vmatprep.subr.mxu0 %v2311_v17  ;;  %1995 = vmatprep.subr.mxu1 %v2321_v19  ;;  %v3389_v17 = vld [vmem:[#allocation18_spill] sm:$0xff]  ;;  %v3390_v19 = vld [vmem:[#allocation13_spill] sm:$0xff] }
 0x5e0   :  { %1925 = vmatpush1.msra.mxu0 %v2306_v16  ;;  %1996 = vmatpush1.msra.mxu1 %v2316_v18  ;;  %v3391_v16 = vld [vmem:[#allocation15_spill] sm:$0xff]  ;;  %v3392_v18 = vld [vmem:[#allocation12_spill] sm:$0xff] }
 0x5e1   :  { %1926 = vmatprep.subr.mxu0 %v3382_v25  ;;  %1997 = vmatprep.subr.mxu1 %v3383_v24 }
 0x5e2   :  { %1927 = vmatpush1.msra.mxu0 %v3384_v26  ;;  %1998 = vmatpush1.msra.mxu1 %v3385_v21 }
 0x5e3   :  { %1928 = vmatprep.subr.mxu0 %v3386_v23  ;;  %1999 = vmatprep.subr.mxu1 %v3387_v20 }
 0x5e4   :  { %1929 = vmatpush1.msra.mxu0 %v3388_v22  ;;  %2000 = vmatpush1.msra.mxu1 %v3389_v17 }
 0x5e5   :  { %1930 = vmatprep.subr.mxu0 %v3390_v19  ;;  %2001 = vmatprep.subr.mxu1 %v3391_v16 }
 0x5e6   :  { %1931 = vmatpush1.msra.mxu0 %v3392_v18  ;;  %2002 = vmatpush1.msra.mxu1 %v3393_v27 }
 0x5e7   :  { %1932 = vmatprep.subr.mxu0 %v3394_v28  ;;  %2003 = vmatprep.subr.mxu1 %v3395_v29 }
 0x5e8   :  { %1933 = vmatpush1.msra.mxu0 %v3396_v30  ;;  %1966 = vmatprep.mubr.f32.mxu0 %v3397_v31 }
 0x5e9   :  { %2004 = vmatpush1.msra.mxu1 %v3398_v32  ;;  %2037 = vmatprep.mubr.f32.mxu1 %v3397_v31 }
 0x689   :  { %v1733_v34 = vpop.f32.mrf.mxu0  ;;  %v1804_v41 = vpop.f32.mrf.mxu1 }
 0x68a   :  { %v1809_v36 = vadd.f32 %v2113_v33, %v1733_v34  ;;  %v1811_v43 = vadd.f32 %v2115_v40, %v1804_v41 }
 0x68b   :  { %v1735_v37 = vpop.f32.mrf.mxu0  ;;  %v1806_v45 = vpop.f32.mrf.mxu1 }
 0x68c   :  { %v1813_v38 = vmul.f32 0.5, %v1809_v36  ;;  %v1810_v39 = vadd.f32 %v2114_v35, %v1735_v37  ;;  %v1812_v46 = vadd.f32 %v2116_v44, %v1806_v45 }
 0x68e   :  { %2185 = vtanh.f32 %v1813_v38  ;;  %v1817_v42 = vmul.f32 0.5, %v1810_v39  ;;  %v1822_v47 = vmul.f32 0.5, %v1812_v46 }
 0x690   :  { %2187 = vtanh.f32 %v1817_v42 }
 0x691   :  { %2189 = vtanh.f32 %v1811_v43 }
 0x692   :  { %2191 = vtanh.f32 %v1822_v47 }
 0x69b   :  { %v2186_v48 = vpop.eup %2185 }
 0x69c   :  { %v1815_v49 = vmul.f32 0.5, %v2186_v48 }
 0x69d   :  { %v2188_v50 = vpop.eup %2187 }
 0x69e   :  { %v1816_v51 = vadd.f32 0.5, %v1815_v49  ;;  %v1819_v52 = vmul.f32 0.5, %v2188_v50  ;;  %v2190_v54 = vpop.eup %2189 }
 0x69f   :  { %v2192_v58 = vpop.eup %2191 }
 0x6a0   :  { %v1820_v53 = vadd.f32 0.5, %v1819_v52  ;;  %v1826_v55 = vmul.f32 %v1816_v51, %v3116_v10  ;;  %v1824_v59 = vmul.f32 0.5, %v2192_v58  ;;  %v2121_v10 = vld [vmem:[%s3217_s0 + $0xf8] sm:$0xff] }
 0x6a2   :  { %v1827_v56 = vmul.f32 %v2190_v54, %v1820_v53  ;;  %v1825_v60 = vadd.f32 0.5, %v1824_v59 }
 0x6a4   :  { %v1828_v57 = vadd.f32 %v1827_v56, %v1826_v55 }
 0x6a6   :  { %2193 = vtanh.f32 %v1828_v57 }
 0x6b3   :  { %v2194_v62 = vpop.eup %2193 }
 0x6b4   :  { %v1830_v9 = vmul.f32 %v2194_v62, %v1825_v60 }
 0x6b6   :  { %2117 = vst [vmem:[%s3219_s2 + $0x30] sm:$0xff] %v1830_v9  ;;  %1967 = vmatmul.mubr.f32.vlgmr.msra.gmra.mxu0 %v1830_v9  ;;  %2038 = vmatmul.mubr.f32.vlgmr.msra.gmra.mxu1 %v1830_v9 }
 0x776   :  { %v1968_v5 = vpop.f32.mrf.mxu0  ;;  %v2039_v11 = vpop.f32.mrf.mxu1 }
 0x777   :  { %v2044_v6 = vadd.f32 %v2118_v1, %v1968_v5  ;;  %v2046_v12 = vadd.f32 %v2120_v13, %v2039_v11 }
 0x778   :  { %v1970_v61 = vpop.f32.mrf.mxu0  ;;  %v2041_v15 = vpop.f32.mrf.mxu1 }
 0x779   :  { %v2048_v14 = vmul.f32 0.5, %v2044_v6  ;;  %v2045_v3 = vadd.f32 %v2119_v0, %v1970_v61  ;;  %v2047_v8 = vadd.f32 %v2121_v10, %v2041_v15 }
 0x77b   :  { %2195 = vtanh.f32 %v2048_v14  ;;  %v2052_v63 = vmul.f32 0.5, %v2045_v3  ;;  %v2057_v4 = vmul.f32 0.5, %v2047_v8 }
 0x77d   :  { %2197 = vtanh.f32 %v2052_v63 }
 0x77e   :  { %2199 = vtanh.f32 %v2046_v12 }
 0x77f   :  { %2201 = vtanh.f32 %v2057_v4 }
 0x788   :  { %v2196_v7 = vpop.eup %2195 }
 0x789   :  { %v2050_v2 = vmul.f32 0.5, %v2196_v7 }
 0x78a   :  { %v2198_v25 = vpop.eup %2197 }
 0x78b   :  { %v2051_v24 = vadd.f32 0.5, %v2050_v2  ;;  %v2054_v26 = vmul.f32 0.5, %v2198_v25  ;;  %v2200_v23 = vpop.eup %2199 }
 0x78c   :  { %v2202_v19 = vpop.eup %2201 }
 0x78d   :  { %v2055_v21 = vadd.f32 0.5, %v2054_v26  ;;  %v2061_v20 = vmul.f32 %v2051_v24, %v1828_v57  ;;  %v2059_v16 = vmul.f32 0.5, %v2202_v19 }
 0x78f   :  { %v2062_v22 = vmul.f32 %v2200_v23, %v2055_v21  ;;  %v2060_v18 = vadd.f32 0.5, %v2059_v16 }
 0x791   :  { %v2063_v17 = vadd.f32 %v2062_v22, %v2061_v20 }
 0x793   :  { %2203 = vtanh.f32 %v2063_v17 }
 0x7a0   :  { %v2204_v27 = vpop.eup %2203 }
 0x7a1   :  { %v2065_v28 = vmul.f32 %v2204_v27, %v2060_v18 }
 0x7a3   :  { %2122 = vst [vmem:[%s3219_s2 + $0x38] sm:$0xff] %v2065_v28 }
 0x7a4   :  { %2074 = vsyncmov [#allocation3] }
 0x7a7   :  { %s2075_s17 = vpop.sfrf %2074 }
 0x7a8   :  { %p2123_p0 = scmp.ne.s32.totalorder %s2075_s17, 0 }
 0x7aa   :  { %2079 = shalt.err (%p2123_p0)  }

</bundles_post_ra>
